<compile_context>
chip_gen: v7x
topology: tpu7x:2x2x1
jax: 0.10.0
libtpu: 0.0.40
codegen_flags: <defaults>
</compile_context>

<pallas_src>
import numpy as np
import jax
import jax.numpy as jnp
from jax.experimental import pallas as pl
from jax.experimental.pallas import tpu as pltpu

BATCH = 45                      # hardcoded by the module's .view(45, 1, 4, 168)
N_ROWS = 168                    # rows of the connectivity ("sequence.csv") table
N_NODES = 168                   # node values per batch element in `input` / `label`
N_TAPS = 4                      # Conv2d kernel_size=(1,4), stride=(1,4)
CONV_OUT_W = N_ROWS // N_TAPS   # 42
FEAT = 4 * CONV_OUT_W           # 168, flattened conv output / Linear width


# --------------------------------------------------------------------------- static setup
def make_synthetic_conn(seed: int = 0):
    """Deterministic stand-in for 'sequence.csv': 168 rows of 3 or 4 node indices
    (already 0-based; the PyTorch code does int(j)-1 on the 1-based CSV entries)."""
    rng = np.random.RandomState(seed)
    idx = np.zeros((N_ROWS, N_TAPS), dtype=np.int32)
    mask = np.ones((N_ROWS, N_TAPS), dtype=np.float32)
    for i in range(N_ROWS):
        n = 3 if (i % 5 == 0) else 4            # 3-entry rows get a zero 4th tap, as in PyTorch
        idx[i, :n] = rng.randint(0, N_NODES, size=n)
        mask[i, n:] = 0.0
    return idx, mask


def build_onehot_taps(conn_idx: np.ndarray, conn_mask: np.ndarray) -> np.ndarray:
    """Static (4, 168, 168) one-hot matrices, one per conv tap k:
           E[k, i, n] = mask[i, k] * [conn[i, k] == n]
    With y_k = w_conv[0,k]*input + w_conv[1,k]*label (45,168),
           M  = sum_k E[k] @ y_k^T                       (168, 45)
    equals the pre-bias Conv2d output of the PyTorch chain
    collect_and_transfer -> .view(45,1,4,168) -> cat -> conv, laid out so the module's
    .view() quirk is exactly the flat reshape (168,45) -> (45,168) of M.
    Derivation: for flat P = B*168 + feat (feat = h*42 + w_out), the conv window at (B,h,w)
    reads flat positions 4P+k of the (168,45,4) gathered tensor, i.e. conn row i0 = P//45,
    source batch b0 = P%45, tap k — so conv_flat[B,feat] = M[P//45, P%45] = M.flat[P].
    """
    e = np.zeros((N_TAPS, N_ROWS, N_NODES), dtype=np.float32)
    rows = np.arange(N_ROWS)
    for k in range(N_TAPS):
        e[k, rows, conn_idx[:, k]] = conn_mask[:, k]
    return e


# --------------------------------------------------------------------------- Pallas kernels
def _conv_relu_kernel(wconv_ref, bconv_ref, e_ref, inp_ref, lab_ref, m_ref):
    # wconv_ref : SMEM (8,)        f32  conv weight, flat index c*4+k (stays live/trainable)
    # bconv_ref : SMEM (1,)        f32  conv bias
    # e_ref     : VMEM (4,168,168) f32  static one-hot tap matrices (pad-mask folded in)
    # inp_ref   : VMEM (45,168)    f32  `input`
    # lab_ref   : VMEM (45,168)    f32  `label`
    # m_ref     : VMEM (168,45)    f32  ReLU(conv) in (conn_row, batch) layout
    x_inp = inp_ref[...]
    x_lab = lab_ref[...]
    acc = None
    for k in range(N_TAPS):                                      # unrolled conv taps
        # Fold the 2 input channels on the VPU (2 scalar*vreg FMAs over ~8 vregs)...
        y_k = wconv_ref[k] * x_inp + wconv_ref[N_TAPS + k] * x_lab          # (45, 168)
        # ...then gather+im2col collapses to a one-hot row-select on the MXU:
        # (168,168) x (45,168)^T -> (168,45); same trans-B contraction as q @ k^T.
        part = jax.lax.dot_general(e_ref[k], y_k,
                                   dimension_numbers=(((1,), (1,)), ((), ())),
                                   preferred_element_type=jnp.float32)
        acc = part if acc is None else acc + part
    m_ref[...] = jnp.maximum(acc + bconv_ref[0], 0.0)            # conv bias + ReLU


def _linear_kernel(h_ref, wlin_t_ref, blin_ref, out_ref):
    # h_ref      : VMEM (45,168)  f32  post-reshape, post-ReLU activations
    # wlin_t_ref : VMEM (168,168) f32  Linear weight, pre-transposed at init (y = x @ W^T + b)
    # blin_ref   : VMEM (1,168)   f32
    # out_ref    : VMEM (45,168)  f32
    out_ref[...] = jnp.dot(h_ref[...], wlin_t_ref[...],
                           preferred_element_type=jnp.float32) + blin_ref[...]


# --------------------------------------------------------------------------- forward wrapper
@jax.jit
def generator_forward(inp, label, w_conv_flat, b_conv, e_taps, w_lin_t, b_lin_row):
    # Stage 1: collect_and_transfer + cat + Conv2d + bias + ReLU, fused into one kernel.
    m_relu = pl.pallas_call(
        _conv_relu_kernel,
        out_shape=jax.ShapeDtypeStruct((N_ROWS, BATCH), jnp.float32),
        in_specs=[
            pl.BlockSpec(memory_space=pltpu.MemorySpace.SMEM),    # conv weight scalars
            pl.BlockSpec(memory_space=pltpu.MemorySpace.SMEM),    # conv bias scalar
            pl.BlockSpec(memory_space=pltpu.MemorySpace.VMEM),    # one-hot tap matrices
            pl.BlockSpec(memory_space=pltpu.MemorySpace.VMEM),    # input
            pl.BlockSpec(memory_space=pltpu.MemorySpace.VMEM),    # label
        ],
        out_specs=pl.BlockSpec(memory_space=pltpu.MemorySpace.VMEM),
    )(w_conv_flat, b_conv, e_taps, inp, label)

    # The module's .view() quirk == flat reshape (168,45)->(45,168).  Mosaic cannot do this
    # cross-tile relayout in-register, so it sits between the two pallas_calls, where it is a
    # zero-cost XLA bitcast (both sides default row-major).
    h = m_relu.reshape(BATCH, FEAT)

    # Stage 2: Linear(168, 168) on the MXU, f32 end-to-end (no bf16 demotion).
    return pl.pallas_call(
        _linear_kernel,
        out_shape=jax.ShapeDtypeStruct((BATCH, FEAT), jnp.float32),
        in_specs=[pl.BlockSpec(memory_space=pltpu.MemorySpace.VMEM)] * 3,
        out_specs=pl.BlockSpec(memory_space=pltpu.MemorySpace.VMEM),
    )(h, w_lin_t, b_lin_row)


# --------------------------------------------------------------------------- fp32 reference
def _collect_and_transfer_ref(x, conn_idx, conn_mask):
    """Faithful JAX port of collect_and_transfer (including the flat .view quirk)."""
    g = x[:, conn_idx] * conn_mask[None, :, :]     # (45,168,4): g[b,i,k] = x[b, conn[i,k]]
    g = jnp.transpose(g, (1, 0, 2))                # (168,45,4) == torch stack of (45,4) rows
    return g.reshape(BATCH, 1, 4, N_ROWS)          # flat reshape == .view(45, 1, 4, 168)


def _reference_f32(inp, label, conn_idx, conn_mask, w_conv, b_conv, w_lin, b_lin):
    x = jnp.concatenate([_collect_and_transfer_ref(inp, conn_idx, conn_mask),
                         _collect_and_transfer_ref(label, conn_idx, conn_mask)], axis=1)
    x5 = x.reshape(BATCH, 2, 4, CONV_OUT_W, 4)
    conv = jnp.einsum('bchwk,ck->bhw', x5, w_conv.reshape(2, 4)) + b_conv[0]
    h = jnp.maximum(conv.reshape(BATCH, FEAT), 0.0)
    return h @ w_lin.T + b_lin[None, :]


# --------------------------------------------------------------------------- main
if __name__ == "__main__":
    key = jax.random.PRNGKey(0)
    k_in, k_lab, k_bc, k_wl, k_bl = jax.random.split(key, 5)

    # Module inputs: 45 batch elements x 168 node values (sizes fixed by the module).
    inp = jax.random.normal(k_in, (BATCH, N_NODES), dtype=jnp.float32)
    label = jax.random.normal(k_lab, (BATCH, N_NODES), dtype=jnp.float32)

    conn_idx_np, conn_mask_np = make_synthetic_conn(seed=0)
    e_taps = jnp.asarray(build_onehot_taps(conn_idx_np, conn_mask_np))     # (4,168,168) f32

    # Parameters (deterministic, matching the module's __init__ shapes).
    w_conv = jnp.array([[[[0.2, 0.1, 0.1, 0.1]],
                         [[0.2, 0.1, 0.1, 0.1]]]], dtype=jnp.float32)      # (1,2,1,4) fixed init
    b_conv = jax.random.uniform(k_bc, (1,), minval=-1.0 / np.sqrt(8.0),
                                maxval=1.0 / np.sqrt(8.0), dtype=jnp.float32)
    bound = 1.0 / np.sqrt(168.0)
    w_lin = jax.random.uniform(k_wl, (168, 168), minval=-bound, maxval=bound,
                               dtype=jnp.float32)                          # Linear1 weight
    b_lin = jax.random.uniform(k_bl, (168,), minval=-bound, maxval=bound,
                               dtype=jnp.float32)                          # Linear1 bias

    # ---- init-time layout hoisting (review: keep weight re-layout out of the forward) ----
    w_conv_flat = w_conv.reshape(8)          # (1,2,1,4) -> (8,)   [channel-major, then tap]
    w_lin_t = jnp.asarray(w_lin.T)           # pre-transposed once
    b_lin_row = b_lin.reshape(1, FEAT)       # lane-dense bias row

    out = generator_forward(inp, label, w_conv_flat, b_conv, e_taps, w_lin_t, b_lin_row)
    out = jax.block_until_ready(out)
    assert out.shape == (BATCH, FEAT)

    ref = _reference_f32(inp, label, jnp.asarray(conn_idx_np), jnp.asarray(conn_mask_np),
                         w_conv, b_conv, w_lin, b_lin)
    # Everything is f32; observed error is ~1e-6 with the f32 MXU path.  Tolerance left wide
    # enough to also cover a bf16-pass matmul decomposition on older compiler versions.
    np.testing.assert_allclose(np.asarray(out), np.asarray(ref), rtol=5e-3, atol=5e-3)

    print("KERNEL_OK")
</pallas_src>

<mosaic_0001>
module attributes {stable_mosaic.version = 11 : i64} {
  func.func @_linear_kernel(%arg0: memref<45x168xf32, #tpu.memory_space<vmem>>, %arg1: memref<168x168xf32, #tpu.memory_space<vmem>>, %arg2: memref<1x168xf32, #tpu.memory_space<vmem>>, %arg3: memref<45x168xf32, #tpu.memory_space<vmem>>) attributes {dimension_semantics = [], scalar_prefetch = 0 : i64, scratch_operands = 0 : i64, tpu.core_type = #tpu.core_type<tc>} {
    %c0 = arith.constant 0 : index
    %c0_0 = arith.constant 0 : index
    %0 = vector.load %arg0[%c0, %c0_0] : memref<45x168xf32, #tpu.memory_space<vmem>>, vector<45x168xf32>
    %c0_1 = arith.constant 0 : index
    %c0_2 = arith.constant 0 : index
    %1 = vector.load %arg1[%c0_1, %c0_2] : memref<168x168xf32, #tpu.memory_space<vmem>>, vector<168x168xf32>
    %cst = arith.constant dense<0.000000e+00> : vector<45x168xf32>
    %2 = tpu.matmul %0, %1, %cst {dimension_numbers = #tpu.dot_dimension_numbers<[1], [0], [0], [1], [0, 0, 1, 1], [], []>} : vector<45x168xf32>, vector<168x168xf32>, vector<45x168xf32> -> vector<45x168xf32>
    %c0_3 = arith.constant 0 : index
    %c0_4 = arith.constant 0 : index
    %3 = vector.load %arg2[%c0_3, %c0_4] : memref<1x168xf32, #tpu.memory_space<vmem>>, vector<1x168xf32>
    %4 = vector.broadcast %3 : vector<1x168xf32> to vector<45x168xf32>
    %5 = arith.addf %2, %4 : vector<45x168xf32>
    %c0_5 = arith.constant 0 : index
    %c0_6 = arith.constant 0 : index
    %6 = vector.load %arg3[%c0_5, %c0_6] : memref<45x168xf32, #tpu.memory_space<vmem>>, vector<45x168xf32>
    tpu.vector_store %arg3[%c0_5, %c0_6], %5 {strides = array<i32>} : memref<45x168xf32, #tpu.memory_space<vmem>>, vector<45x168xf32>,
    return
  }
}

module attributes {stable_mosaic.version = 11 : i64} {
  func.func @_conv_relu_kernel(%arg0: memref<8xf32, #tpu.memory_space<smem>>, %arg1: memref<1xf32, #tpu.memory_space<smem>>, %arg2: memref<4x168x168xf32, #tpu.memory_space<vmem>>, %arg3: memref<45x168xf32, #tpu.memory_space<vmem>>, %arg4: memref<45x168xf32, #tpu.memory_space<vmem>>, %arg5: memref<168x45xf32, #tpu.memory_space<vmem>>) attributes {dimension_semantics = [], scalar_prefetch = 0 : i64, scratch_operands = 0 : i64, tpu.core_type = #tpu.core_type<tc>} {
    %c0 = arith.constant 0 : index
    %c0_0 = arith.constant 0 : index
    %0 = vector.load %arg3[%c0, %c0_0] : memref<45x168xf32, #tpu.memory_space<vmem>>, vector<45x168xf32>
    %c0_1 = arith.constant 0 : index
    %c0_2 = arith.constant 0 : index
    %1 = vector.load %arg4[%c0_1, %c0_2] : memref<45x168xf32, #tpu.memory_space<vmem>>, vector<45x168xf32>
    %c0_3 = arith.constant 0 : index
    %2 = memref.load %arg0[%c0_3] : memref<8xf32, #tpu.memory_space<smem>>
    %3 = vector.broadcast %2 : f32 to vector<45x168xf32>
    %4 = arith.mulf %3, %0 : vector<45x168xf32>
    %c4 = arith.constant 4 : index
    %5 = memref.load %arg0[%c4] : memref<8xf32, #tpu.memory_space<smem>>
    %6 = vector.broadcast %5 : f32 to vector<45x168xf32>
    %7 = arith.mulf %6, %1 : vector<45x168xf32>
    %8 = arith.addf %4, %7 : vector<45x168xf32>
    %c0_4 = arith.constant 0 : index
    %c0_5 = arith.constant 0 : index
    %c0_6 = arith.constant 0 : index
    %9 = vector.load %arg2[%c0_4, %c0_5, %c0_6] : memref<4x168x168xf32, #tpu.memory_space<vmem>>, vector<1x168x168xf32>
    %10 = vector.shape_cast %9 : vector<1x168x168xf32> to vector<168x168xf32>
    %cst = arith.constant dense<0.000000e+00> : vector<168x45xf32>
    %11 = tpu.matmul %10, %8, %cst {dimension_numbers = #tpu.dot_dimension_numbers<[1], [1], [0], [0], [0, 0, 1, 0], [], []>} : vector<168x168xf32>, vector<45x168xf32>, vector<168x45xf32> -> vector<168x45xf32>
    %c1 = arith.constant 1 : index
    %12 = memref.load %arg0[%c1] : memref<8xf32, #tpu.memory_space<smem>>
    %13 = vector.broadcast %12 : f32 to vector<45x168xf32>
    %14 = arith.mulf %13, %0 : vector<45x168xf32>
    %c5 = arith.constant 5 : index
    %15 = memref.load %arg0[%c5] : memref<8xf32, #tpu.memory_space<smem>>
    %16 = vector.broadcast %15 : f32 to vector<45x168xf32>
    %17 = arith.mulf %16, %1 : vector<45x168xf32>
    %18 = arith.addf %14, %17 : vector<45x168xf32>
    %c1_7 = arith.constant 1 : index
    %c0_8 = arith.constant 0 : index
    %c0_9 = arith.constant 0 : index
    %19 = vector.load %arg2[%c1_7, %c0_8, %c0_9] : memref<4x168x168xf32, #tpu.memory_space<vmem>>, vector<1x168x168xf32>
    %20 = vector.shape_cast %19 : vector<1x168x168xf32> to vector<168x168xf32>
    %cst_10 = arith.constant dense<0.000000e+00> : vector<168x45xf32>
    %21 = tpu.matmul %20, %18, %cst_10 {dimension_numbers = #tpu.dot_dimension_numbers<[1], [1], [0], [0], [0, 0, 1, 0], [], []>} : vector<168x168xf32>, vector<45x168xf32>, vector<168x45xf32> -> vector<168x45xf32>
    %22 = arith.addf %11, %21 : vector<168x45xf32>
    %c2 = arith.constant 2 : index
    %23 = memref.load %arg0[%c2] : memref<8xf32, #tpu.memory_space<smem>>
    %24 = vector.broadcast %23 : f32 to vector<45x168xf32>
    %25 = arith.mulf %24, %0 : vector<45x168xf32>
    %c6 = arith.constant 6 : index
    %26 = memref.load %arg0[%c6] : memref<8xf32, #tpu.memory_space<smem>>
    %27 = vector.broadcast %26 : f32 to vector<45x168xf32>
    %28 = arith.mulf %27, %1 : vector<45x168xf32>
    %29 = arith.addf %25, %28 : vector<45x168xf32>
    %c2_11 = arith.constant 2 : index
    %c0_12 = arith.constant 0 : index
    %c0_13 = arith.constant 0 : index
    %30 = vector.load %arg2[%c2_11, %c0_12, %c0_13] : memref<4x168x168xf32, #tpu.memory_space<vmem>>, vector<1x168x168xf32>
    %31 = vector.shape_cast %30 : vector<1x168x168xf32> to vector<168x168xf32>
    %cst_14 = arith.constant dense<0.000000e+00> : vector<168x45xf32>
    %32 = tpu.matmul %31, %29, %cst_14 {dimension_numbers = #tpu.dot_dimension_numbers<[1], [1], [0], [0], [0, 0, 1, 0], [], []>} : vector<168x168xf32>, vector<45x168xf32>, vector<168x45xf32> -> vector<168x45xf32>
    %33 = arith.addf %22, %32 : vector<168x45xf32>
    %c3 = arith.constant 3 : index
    %34 = memref.load %arg0[%c3] : memref<8xf32, #tpu.memory_space<smem>>
    %35 = vector.broadcast %34 : f32 to vector<45x168xf32>
    %36 = arith.mulf %35, %0 : vector<45x168xf32>
    %c7 = arith.constant 7 : index
    %37 = memref.load %arg0[%c7] : memref<8xf32, #tpu.memory_space<smem>>
    %38 = vector.broadcast %37 : f32 to vector<45x168xf32>
    %39 = arith.mulf %38, %1 : vector<45x168xf32>
    %40 = arith.addf %36, %39 : vector<45x168xf32>
    %c3_15 = arith.constant 3 : index
    %c0_16 = arith.constant 0 : index
    %c0_17 = arith.constant 0 : index
    %41 = vector.load %arg2[%c3_15, %c0_16, %c0_17] : memref<4x168x168xf32, #tpu.memory_space<vmem>>, vector<1x168x168xf32>
    %42 = vector.shape_cast %41 : vector<1x168x168xf32> to vector<168x168xf32>
    %cst_18 = arith.constant dense<0.000000e+00> : vector<168x45xf32>
    %43 = tpu.matmul %42, %40, %cst_18 {dimension_numbers = #tpu.dot_dimension_numbers<[1], [1], [0], [0], [0, 0, 1, 0], [], []>} : vector<168x168xf32>, vector<45x168xf32>, vector<168x45xf32> -> vector<168x45xf32>
    %44 = arith.addf %33, %43 : vector<168x45xf32>
    %c0_19 = arith.constant 0 : index
    %45 = memref.load %arg1[%c0_19] : memref<1xf32, #tpu.memory_space<smem>>
    %46 = vector.broadcast %45 : f32 to vector<168x45xf32>
    %47 = arith.addf %44, %46 : vector<168x45xf32>
    %cst_20 = arith.constant 0.000000e+00 : f32
    %48 = vector.broadcast %cst_20 : f32 to vector<168x45xf32>
    %49 = arith.maximumf %47, %48 : vector<168x45xf32>
    %c0_21 = arith.constant 0 : index
    %c0_22 = arith.constant 0 : index
    %50 = vector.load %arg5[%c0_21, %c0_22] : memref<168x45xf32, #tpu.memory_space<vmem>>, vector<168x45xf32>
    tpu.vector_store %arg5[%c0_21, %c0_22], %49 {strides = array<i32>} : memref<168x45xf32, #tpu.memory_space<vmem>>, vector<168x45xf32>,
    return
  }
}

</mosaic_0001>

<bundles_post_ra>
// kernel: generator_forward.3
= control target key start
LH: loop header
LB: loop body
LE: loop exit
PB: predicated region body
PF: predicated region fallthrough
CT: control target
= control target key end

     0   :  { %vm81_vm0 = vcmask 326656   ;;  %s536_s0 = inlined_call_operand.vmem [shape: f32[45,168], index: 0, kind: input, shape index: {}]   ;;  %s537_s1 = inlined_call_operand.vmem [shape: f32[168,168], index: 1, kind: input, shape index: {}]   ;;  %s538_s2 = inlined_call_operand.vmem [shape: f32[1,168], index: 2, kind: input, shape index: {}]   ;;  %s539_s3 = inlined_call_operand.hbm [shape: f32[45,168], index: 3, kind: output, shape index: {}]  }
   0x1   :  { %v28_v0 = vld [vmem:[%s537_s1 + $0x8] sm:$0xff]  ;;  %v30_v1 = vld [vmem:[%s537_s1 + $0x18] sm:$0xff]  ;;  %v27_v2 = vld [vmem:[%s537_s1] sm:$0xff] }
   0x2   :  { %v236_v3 = vpack.c.bf16 %v30_v1, %v28_v0  ;;  %v29_v4 = vld [vmem:[%s537_s1 + $0x10] sm:$0xff]  ;;  %v32_v5 = vld [vmem:[%s537_s1 + $0x28] sm:$0xff]  ;;  %v34_v6 = vld [vmem:[%s537_s1 + $0x38] sm:$0xff] }
   0x3   :  { %v238_v7 = vpack.c.bf16 %v29_v4, %v27_v2  ;;  %v240_v8 = vpack.c.bf16 %v34_v6, %v32_v5  ;;  %v31_v9 = vld [vmem:[%s537_s1 + $0x20] sm:$0xff]  ;;  %v33_v10 = vld [vmem:[%s537_s1 + $0x30] sm:$0xff]  ;;  %v36_v11 = vld [vmem:[%s537_s1 + $0x48] sm:$0xff] }
   0x4   :  { %237 = vmatprep.subr.bf16.mxu0 %v236_v3  ;;  %276 = vmatprep.subr.bf16.mxu1 %v236_v3  ;;  %v38_v12 = vld [vmem:[%s537_s1 + $0x58] sm:$0xff]  ;;  %v242_v13 = vpack.c.bf16 %v33_v10, %v31_v9  ;;  %v35_v15 = vld [vmem:[%s537_s1 + $0x40] sm:$0xff]  ;;  %v37_v16 = vld [vmem:[%s537_s1 + $0x50] sm:$0xff] }
   0x5   :  { %239 = vmatpush1.bf16.msra.mxu0 %v238_v7  ;;  %287 = vmatpush1.bf16.msra.mxu1 %v238_v7  ;;  %v244_v14 = vpack.c.bf16 %v38_v12, %v36_v11  ;;  %v40_v17 = vld [vmem:[%s537_s1 + $0x68] sm:$0xff]  ;;  %v42_v18 = vld [vmem:[%s537_s1 + $0x78] sm:$0xff]  ;;  %v246_v19 = vpack.c.bf16 %v37_v16, %v35_v15  ;;  %v39_v21 = vld [vmem:[%s537_s1 + $0x60] sm:$0xff] }
   0x6   :  { %241 = vmatprep.subr.bf16.mxu0 %v240_v8  ;;  %277 = vmatprep.subr.bf16.mxu1 %v240_v8  ;;  %v248_v20 = vpack.c.bf16 %v42_v18, %v40_v17  ;;  %v41_v22 = vld [vmem:[%s537_s1 + $0x70] sm:$0xff]  ;;  %v44_v23 = vld [vmem:[%s537_s1 + $0x88] sm:$0xff]  ;;  %v46_v24 = vld [vmem:[%s537_s1 + $0x98] sm:$0xff] }
   0x7   :  { %v250_v25 = vpack.c.bf16 %v41_v22, %v39_v21  ;;  %v252_v26 = vpack.c.bf16 %v46_v24, %v44_v23  ;;  %v43_v27 = vld [vmem:[%s537_s1 + $0x80] sm:$0xff]  ;;  %v45_v28 = vld [vmem:[%s537_s1 + $0x90] sm:$0xff]  ;;  %v48_v29 = vld [vmem:[%s537_s1 + $0xa8] sm:$0xff] }
   0x8   :  { %v50_v30 = vld [vmem:[%s537_s1 + $0xb8] sm:$0xff]  ;;  %v16_v31 = vld [vmem:[%s536_s0 + $0x8] sm:$0xff]  ;;  %v254_v33 = vpack.c.bf16 %v45_v28, %v43_v27  ;;  %v47_v35 = vld [vmem:[%s537_s1 + $0xa0] sm:$0xff] }
   0x9   :  { %243 = vmatpush1.bf16.msra.mxu0 %v242_v13  ;;  %288 = vmatpush1.bf16.msra.mxu1 %v242_v13  ;;  %v22_v32 = vld [vmem:[%s536_s0 + $0x38] sm:$0xff]  ;;  %v256_v34 = vpack.c.bf16 %v50_v30, %v48_v29  ;;  %v49_v36 = vld [vmem:[%s537_s1 + $0xb0] sm:$0xff]  ;;  %v52_v37 = vld [vmem:[%s537_s1 + $0xc8] sm:$0xff] }
   0xa   :  { %245 = vmatprep.subr.bf16.mxu0 %v244_v14  ;;  %278 = vmatprep.subr.bf16.mxu1 %v244_v14  ;;  %v54_v38 = vld [vmem:[%s537_s1 + $0xd8] sm:$0xff] }
   0xb   :  { %230 = vmatprep.mubr.msk.f32.mxu0 %vm81_vm0, %v16_v31  ;;  %233 = vmatprep.mubr.msk.f32.mxu1 %vm81_vm0, %v22_v32 }
   0xd   :  { %247 = vmatpush1.bf16.msra.mxu0 %v246_v19  ;;  %289 = vmatpush1.bf16.msra.mxu1 %v246_v19 }
   0xe   :  { %249 = vmatprep.subr.bf16.mxu0 %v248_v20  ;;  %279 = vmatprep.subr.bf16.mxu1 %v248_v20 }
  0x11   :  { %251 = vmatpush1.bf16.msra.mxu0 %v250_v25  ;;  %290 = vmatpush1.bf16.msra.mxu1 %v250_v25 }
  0x12   :  { %253 = vmatprep.subr.bf16.mxu0 %v252_v26  ;;  %280 = vmatprep.subr.bf16.mxu1 %v252_v26 }
  0x13   :  { %8 = vsyncpa [#allocation3], 0  ;;  %v258_v39 = vpack.c.bf16 %v49_v36, %v47_v35  ;;  %v260_v40 = vpack.c.bf16 %v54_v38, %v52_v37  ;;  %v51_v41 = vld [vmem:[%s537_s1 + $0xc0] sm:$0xff]  ;;  %v53_v42 = vld [vmem:[%s537_s1 + $0xd0] sm:$0xff]  ;;  %v71_v10 = vlaneseq  ;;  %vm212_vm1 = vcmask 323584  }
  0x14   :  { %v56_v43 = vld [vmem:[%s537_s1 + $0xe8] sm:$0xff]  ;;  %v58_v44 = vld [vmem:[%s537_s1 + $0xf8] sm:$0xff]  ;;  %v262_v45 = vpack.c.bf16 %v53_v42, %v51_v41  ;;  %v55_v47 = vld [vmem:[%s537_s1 + $0xe0] sm:$0xff] }
  0x15   :  { %255 = vmatpush1.bf16.msra.mxu0 %v254_v33  ;;  %291 = vmatpush1.bf16.msra.mxu1 %v254_v33  ;;  %v264_v46 = vpack.c.bf16 %v58_v44, %v56_v43  ;;  %v57_v48 = vld [vmem:[%s537_s1 + $0xf0] sm:$0xff]  ;;  %v60_v49 = vld [vmem:[%s537_s1 + $0x108] sm:$0xff]  ;;  %v62_v50 = vld [vmem:[%s537_s1 + $0x118] sm:$0xff]  ;;  %v72_v11 = vshrl.u32 %v71_v10, 7 }
  0x16   :  { %257 = vmatprep.subr.bf16.mxu0 %v256_v34  ;;  %281 = vmatprep.subr.bf16.mxu1 %v256_v34  ;;  %v266_v51 = vpack.c.bf16 %v57_v48, %v55_v47  ;;  %v268_v52 = vpack.c.bf16 %v62_v50, %v60_v49  ;;  %v59_v53 = vld [vmem:[%s537_s1 + $0x100] sm:$0xff]  ;;  %v61_v54 = vld [vmem:[%s537_s1 + $0x110] sm:$0xff]  ;;  %v64_v55 = vld [vmem:[%s537_s1 + $0x128] sm:$0xff] }
  0x17   :  { %v66_v56 = vld [vmem:[%s537_s1 + $0x138] sm:$0xff]  ;;  %v270_v57 = vpack.c.bf16 %v61_v54, %v59_v53  ;;  %v63_v59 = vld [vmem:[%s537_s1 + $0x120] sm:$0xff]  ;;  %v65_v60 = vld [vmem:[%s537_s1 + $0x130] sm:$0xff]  ;;  %v73_v12 = vsub.s32 0, %v72_v11  ;;  %v77_v14 = vsub.s32 1, %v72_v11 }
  0x18   :  { %v272_v58 = vpack.c.bf16 %v66_v56, %v64_v55  ;;  %v274_v61 = vpack.c.bf16 %v65_v60, %v63_v59  ;;  %v68_v62 = vld [vmem:[%s537_s1 + $0x148] sm:$0xff]  ;;  %v67_v63 = vld [vmem:[%s537_s1 + $0x140] sm:$0xff]  ;;  %v21_v1 = vld [vmem:[%s536_s0 + $0x30] sm:$0xff] }
  0x19   :  { %259 = vmatpush1.bf16.msra.mxu0 %v258_v39  ;;  %292 = vmatpush1.bf16.msra.mxu1 %v258_v39  ;;  %v15_v0 = vld [vmem:[%s536_s0] sm:$0xff]  ;;  %v18_v2 = vld [vmem:[%s536_s0 + $0x18] sm:$0xff]  ;;  %v24_v3 = vld [vmem:[%s536_s0 + $0x48] sm:$0xff] }
  0x1a   :  { %261 = vmatprep.subr.bf16.mxu0 %v260_v40  ;;  %282 = vmatprep.subr.bf16.mxu1 %v260_v40  ;;  %v17_v4 = vld [vmem:[%s536_s0 + $0x10] sm:$0xff]  ;;  %v23_v5 = vld [vmem:[%s536_s0 + $0x40] sm:$0xff]  ;;  %v20_v6 = vld [vmem:[%s536_s0 + $0x28] sm:$0xff] }
  0x1b   :  { %v26_v7 = vld [vmem:[%s536_s0 + $0x58] sm:$0x1f]  ;;  %v19_v8 = vld [vmem:[%s536_s0 + $0x20] sm:$0xff]  ;;  %v25_v9 = vld [vmem:[%s536_s0 + $0x50] sm:$0x1f]  ;;  %s325_s0 = smov [#allocation2]  }
  0x1c   :  { %v69_v13 = vld [vmem:[%s538_s2] sm:$0x3]  ;;  %s219_s2 = sshll.u32 %s325_s0, 4  ;;  %s220_s2 = int_to_ptr.vmem [resolvable:$true] %s219_s2 }
  0x1d   :  { %263 = vmatpush1.bf16.msra.mxu0 %v262_v45  ;;  %293 = vmatpush1.bf16.msra.mxu1 %v262_v45  ;;  %v74_v15 = vrot.slane %v69_v13, %v73_v12  ;;  %v78_v16 = vrot.slane %v69_v13, %v77_v14  ;;  %s301_s13 = scalar_lea.vmem %s220_s2, 1536  ;;  %p306_p1 = scmp.lt.s32.totalorder %s220_s2, %s220_s2 }
  0x1e   :  { %265 = vmatprep.subr.bf16.mxu0 %v264_v46  ;;  %283 = vmatprep.subr.bf16.mxu1 %v264_v46  ;;  %p302_p0 = scmp.ne.s32.totalorder %s220_s2, %s301_s13  ;;  %p307_p2 = scmp.lt.s32.totalorder %s301_s13, %s301_s13 }
  0x20   :  { %p308_p3 = por %p307_p2, %p306_p1 }
  0x21   :  { %267 = vmatpush1.bf16.msra.mxu0 %v266_v51  ;;  %294 = vmatpush1.bf16.msra.mxu1 %v266_v51 }
  0x22   :  { %269 = vmatprep.subr.bf16.mxu0 %v268_v52  ;;  %284 = vmatprep.subr.bf16.mxu1 %v268_v52  ;;  %p309_p4 = pnand %p308_p3, %p302_p0 }
  0x25   :  { %271 = vmatpush1.bf16.msra.mxu0 %v270_v57  ;;  %295 = vmatpush1.bf16.msra.mxu1 %v270_v57 }
  0x26   :  { %273 = vmatprep.subr.bf16.mxu0 %v272_v58  ;;  %285 = vmatprep.subr.bf16.mxu1 %v272_v58 }
  0x29   :  { %275 = vmatpush1.bf16.msra.mxu0 %v274_v61  ;;  %296 = vmatpush1.bf16.msra.mxu1 %v274_v61 }
  0x2a   :  { %140 = vmatprep.subr.mxu0 %v68_v62  ;;  %286 = vmatprep.subr.mxu1 %v68_v62 }
  0x2d   :  { %141 = vmatpush1.msra.mxu0 %v67_v63  ;;  %297 = vmatpush1.msra.mxu1 %v67_v63 }
  0x2e   :  { %165 = vmatmul.mubr.f32.vlgmr.msra.gmra.mrb[0].mxu0 %v15_v0  ;;  %183 = vmatmul.mubr.f32.vlgmr.msra.gmra.mrb[0].mxu1 %v21_v1 }
  0x2f   :  { %231 = vmatprep.mubr.msk.f32.mxu0 %vm81_vm0, %v18_v2  ;;  %234 = vmatprep.mubr.msk.f32.mxu1 %vm81_vm0, %v24_v3 }
  0x32   :  { %171 = vmatmul.mubr.f32.gmra.mrb[2].mxu0 %v17_v4  ;;  %189 = vmatmul.mubr.f32.gmra.mrb[2].mxu1 %v23_v5 }
  0x33   :  { %232 = vmatprep.mubr.msk.f32.mxu0 %vm81_vm0, %v20_v6  ;;  %235 = vmatprep.mubr.msk.f32.mxu1 %vm81_vm0, %v26_v7 }
  0x36   :  { %177 = vmatmul.mubr.f32.gmra.mrb[4].mxu0 %v19_v8  ;;  %195 = vmatmul.mubr.f32.gmra.mrb[4].mxu1 %v25_v9 }
 0x101   :  { %v166_v17 = vpop.f32.mrb[0].mxu0  ;;  %v184_v18 = vpop.f32.mrb[0].mxu1 }
 0x102   :  { %v167_v19 = vadd.f32 %v166_v17, %v74_v15  ;;  %v185_v20 = vadd.f32 %v184_v18, %v74_v15  ;;  %v168_v21 = vpop.f32.mrb[1].mxu0  ;;  %v186_v22 = vpop.f32.mrb[1].mxu1 }
 0x103   :  { %v169_v23 = vadd.f32 %v168_v21, %v78_v16  ;;  %v187_v24 = vadd.f32 %v186_v22, %v78_v16 }
 0x104   :  { %201 = vst [vmem:[#allocation2] sm:$0xff] %v167_v19  ;;  %207 = vst [vmem:[#allocation2 + $0x30] sm:$0xff] %v185_v20 }
 0x105   :  { %202 = vst.msk [vmem:[#allocation2 + $0x8] sm:$0xff] %vm81_vm0, %v169_v23  ;;  %208 = vst.msk [vmem:[#allocation2 + $0x38] sm:$0xff] %vm81_vm0, %v187_v24  ;;  %v172_v25 = vpop.f32.mrb[2].mxu0  ;;  %v190_v26 = vpop.f32.mrb[2].mxu1 }
 0x106   :  { %v173_v27 = vadd.f32 %v172_v25, %v74_v15  ;;  %v191_v28 = vadd.f32 %v190_v26, %v74_v15  ;;  %v174_v29 = vpop.f32.mrb[3].mxu0  ;;  %v192_v30 = vpop.f32.mrb[3].mxu1 }
 0x107   :  { %v175_v31 = vadd.f32 %v174_v29, %v78_v16  ;;  %v193_v32 = vadd.f32 %v192_v30, %v78_v16 }
 0x108   :  { %203 = vst [vmem:[#allocation2 + $0x10] sm:$0xff] %v173_v27  ;;  %209 = vst [vmem:[#allocation2 + $0x40] sm:$0xff] %v191_v28 }
 0x109   :  { %204 = vst.msk [vmem:[#allocation2 + $0x18] sm:$0xff] %vm81_vm0, %v175_v31  ;;  %210 = vst.msk [vmem:[#allocation2 + $0x48] sm:$0xff] %vm81_vm0, %v193_v32  ;;  %v178_v33 = vpop.f32.mrb[4].mxu0  ;;  %v196_v34 = vpop.f32.mrb[4].mxu1 }
 0x10a   :  { %v179_v35 = vadd.f32 %v178_v33, %v74_v15  ;;  %v197_v36 = vadd.f32 %v196_v34, %v74_v15  ;;  %v180_v37 = vpop.f32.mrb[5].mxu0  ;;  %v198_v38 = vpop.f32.mrb[5].mxu1 }
 0x10b   :  { %v181_v39 = vadd.f32 %v180_v37, %v78_v16  ;;  %v199_v40 = vadd.f32 %v198_v38, %v78_v16 }
 0x10c   :  { %205 = vst [vmem:[#allocation2 + $0x20] sm:$0xff] %v179_v35  ;;  %211 = vst [vmem:[#allocation2 + $0x50] sm:$0x1f] %v197_v36 }
 0x10d   :  { %206 = vst.msk [vmem:[#allocation2 + $0x28] sm:$0xff] %vm81_vm0, %v181_v39 }
 0x10e   :  { %213 = vst.msk [vmem:[#allocation2 + $0x58] sm:$0x1f] %vm212_vm1, %v199_v40 }
 0x10f   :  { %312 = shalt.err (!%p309_p4)
}
 0x110   :  { %s313_s16 = scalar_lea.hbm %s539_s3, 1536 }
 0x111   :  { %p314_p5 = scmp.ne.s32.totalorder %s539_s3, %s313_s16  ;;  %p317_p6 = scmp.lt.u32.totalorder %s313_s16, %s539_s3 }
 0x113   :  { %p319_p7 = pnand %p317_p6, %p314_p5 }
 0x115   :  { %322 = shalt.err (!%p319_p7)
}
 0x116   :  { %s326_s21 = smov 256   ;;  %s327_s22 = smov 16  }
 0x117   :  { %225 = dma.vmem_to_hbm [thread:$0]  %s220_s2, 1536, %s539_s3, [#allocation3], %s326_s21, %s326_s21, %s327_s22  }
 0x118   :  { %323 = dma.done.wait [#allocation3], 1536  }
 0x119   :  { %324 = vsyncadd [#allocation3], 4294965760 }
 0x11a   :  { %229 = vsyncpa [#allocation3], 1 }

// kernel: generator_forward.2
= control target key start
LH: loop header
LB: loop body
LE: loop exit
PB: predicated region body
PF: predicated region fallthrough
CT: control target
= control target key end

     0   :  { %11 = vsyncpa [#allocation5], 0  ;;  %s2461_s0 = inlined_call_operand.vmem [shape: f32[8], index: 0, kind: input, shape index: {}]   ;;  %s2462_s1 = inlined_call_operand.<no memory space> [shape: f32[1], index: 1, kind: input, shape index: {}]   ;;  %s2463_s2 = inlined_call_operand.hbm [shape: f32[4,168,168], index: 2, kind: input, shape index: {}]   ;;  %s2464_s3 = inlined_call_operand.hbm [shape: f32[45,168], index: 3, kind: input, shape index: {}]   ;;  %s2465_s4 = inlined_call_operand.hbm [shape: f32[45,168], index: 4, kind: input, shape index: {}]   ;;  %s2466_s5 = inlined_call_operand.vmem [shape: f32[168,45], index: 5, kind: output, shape index: {}]  }
   0x1   :  { %12 = vsyncpa [#allocation4], 0 }
   0x2   :  { %13 = vsyncpa [#allocation8], 0  ;;  %s20_s20 = sshll.u32 %s2461_s0, 4  ;;  %s1815_s21 = smov [#allocation7]   ;;  %s21_s20 = int_to_ptr.vmem [resolvable:$true] %s20_s20 }
   0x3   :  { %s43_s22 = sshll.u32 %s1815_s21, 4  ;;  %s1731_s25 = scalar_lea.hbm %s2464_s3, 1536  ;;  %s44_s22 = int_to_ptr.vmem [resolvable:$true] %s43_s22 }
   0x4   :  { %p1732_p0 = scmp.ne.s32.totalorder %s2464_s3, %s1731_s25  ;;  %p1735_p1 = scmp.lt.u32.totalorder %s1731_s25, %s2464_s3 }
   0x6   :  { %p1737_p2 = pnand %p1735_p1, %p1732_p0 }
   0x8   :  { %1740 = shalt.err (!%p1737_p2)
}
   0x9   :  { %s1741_s30 = scalar_lea.vmem %s44_s22, 1536  ;;  %p1746_p4 = scmp.lt.s32.totalorder %s44_s22, %s44_s22 }
   0xa   :  { %p1742_p3 = scmp.ne.s32.totalorder %s44_s22, %s1741_s30  ;;  %p1747_p5 = scmp.lt.s32.totalorder %s1741_s30, %s1741_s30 }
   0xc   :  { %p1748_p6 = por %p1747_p5, %p1746_p4 }
   0xe   :  { %p1749_p7 = pnand %p1748_p6, %p1742_p3 }
  0x10   :  { %1752 = shalt.err (!%p1749_p7)
}
  0x11   :  { %s1816_s0 = smov 256   ;;  %s1817_s6 = smov 16  }
  0x12   :  { %49 = dma.hbm_to_vmem [thread:$0]  %s2464_s3, 1536, %s44_s22, [#allocation8], %s1816_s0, %s1816_s0, %s1817_s6  }
  0x13   :  { %s1753_s9 = scalar_lea.vmem %s21_s20, 16  ;;  %p1758_p9 = scmp.lt.s32.totalorder %s21_s20, %s21_s20 }
  0x14   :  { %p1754_p8 = scmp.ne.s32.totalorder %s21_s20, %s1753_s9  ;;  %p1759_p10 = scmp.lt.s32.totalorder %s1753_s9, %s1753_s9 }
  0x16   :  { %p1760_p11 = por %p1759_p10, %p1758_p9 }
  0x18   :  { %p1761_p12 = pnand %p1760_p11, %p1754_p8 }
  0x1a   :  { %1764 = shalt.err (!%p1761_p12)
}
  0x1b   :  { %s1818_s10 = smov [#allocation3]   ;;  %s1819_s11 = smov [#allocation6]  }
  0x1c   :  { %23 = dma.vmem_to_smem %s21_s20, 16, %s1818_s10, [#allocation5]  }
  0x1d   :  { %s31_s12 = sshll.u32 %s1819_s11, 4  ;;  %s1820_s13 = smov [#allocation9]   ;;  %s32_s12 = int_to_ptr.vmem [resolvable:$true] %s31_s12 }
  0x1e   :  { %s55_s14 = sshll.u32 %s1820_s13, 4  ;;  %s1765_s3 = scalar_lea.hbm %s2463_s2, 21504  ;;  %s1869_s14 = int_to_ptr.vmem [resolvable:$true] %s55_s14 }
  0x1f   :  { %p1766_p13 = scmp.ne.s32.totalorder %s2463_s2, %s1765_s3  ;;  %p1769_p0 = scmp.lt.u32.totalorder %s1765_s3, %s2463_s2 }
  0x21   :  { %p1771_p1 = pnand %p1769_p0, %p1766_p13 }
  0x23   :  { %1774 = shalt.err (!%p1771_p1)
}
  0x24   :  { %s1775_s20 = scalar_lea.vmem %s32_s12, 21504  ;;  %p1780_p3 = scmp.lt.s32.totalorder %s32_s12, %s32_s12 }
  0x25   :  { %p1776_p2 = scmp.ne.s32.totalorder %s32_s12, %s1775_s20  ;;  %p1781_p4 = scmp.lt.s32.totalorder %s1775_s20, %s1775_s20 }
  0x27   :  { %p1782_p5 = por %p1781_p4, %p1780_p3 }
  0x29   :  { %p1783_p6 = pnand %p1782_p5, %p1776_p2 }
  0x2b   :  { %1786 = shalt.err (!%p1783_p6)
}
  0x2c   :  { %37 = dma.hbm_to_vmem [thread:$0]  %s2463_s2, 21504, %s32_s12, [#allocation4], %s1816_s0, %s1816_s0, %s1817_s6  }
  0x2d   :  { %s1787_s26 = scalar_lea.hbm %s2465_s4, 1536 }
  0x2e   :  { %p1788_p7 = scmp.ne.s32.totalorder %s2465_s4, %s1787_s26  ;;  %p1791_p8 = scmp.lt.u32.totalorder %s1787_s26, %s2465_s4 }
  0x30   :  { %p1793_p9 = pnand %p1791_p8, %p1788_p7 }
  0x32   :  { %1796 = shalt.err (!%p1793_p9)
}
  0x33   :  { %s1797_s7 = scalar_lea.vmem %s1869_s14, 1536  ;;  %p1802_p11 = scmp.lt.s32.totalorder %s1869_s14, %s1869_s14 }
  0x34   :  { %p1798_p10 = scmp.ne.s32.totalorder %s1869_s14, %s1797_s7  ;;  %p1803_p12 = scmp.lt.s32.totalorder %s1797_s7, %s1797_s7 }
  0x36   :  { %p1804_p13 = por %p1803_p12, %p1802_p11 }
  0x38   :  { %p1805_p0 = pnand %p1804_p13, %p1798_p10 }
  0x3a   :  { %1808 = shalt.err (!%p1805_p0)
}
  0x3b   :  { %61 = dma.hbm_to_vmem [thread:$0]  %s2465_s4, 1536, %s1869_s14, [#allocation8], %s1816_s0, %s1816_s0, %s1817_s6  }
  0x3c   :  { %1809 = dma.done.wait [#allocation5], 16  }
  0x3d   :  { %1810 = vsyncadd [#allocation5], 4294967280 }
  0x3e   :  { %1811 = dma.done.wait [#allocation4], 21504  }
  0x3f   :  { %1812 = vsyncadd [#allocation4], 4294945792 }
  0x40   :  { %1813 = dma.done.wait [#allocation8], 3072  }
  0x41   :  { %1814 = vsyncadd [#allocation8], 4294964224 }
  0x42   :  { %74 = sfence }
  0x43   :  { %s1551_s9 = sld [smem:[#allocation3 + $0x1]]  ;;  %s1552_s10 = sld [smem:[#allocation3 + $0x5]]  ;;  %v1906_v0 = vld [vmem:[#allocation7 + $0x8] sm:$0xff]  ;;  %v1908_v1 = vld [vmem:[#allocation7 + $0x18] sm:$0xff]  ;;  %v1912_v3 = vld [vmem:[#allocation7] sm:$0xff]  ;;  %vm264_vm0 = vcmask 326656  }
  0x44   :  { %s99_s11 = sld [smem:[#allocation3]]  ;;  %s1550_s12 = sld [smem:[#allocation3 + $0x4]]  ;;  %v1910_v2 = vld [vmem:[#allocation9 + $0x8] sm:$0xff]  ;;  %v1914_v4 = vld [vmem:[#allocation9 + $0x18] sm:$0xff]  ;;  %v1916_v5 = vld [vmem:[#allocation7 + $0x10] sm:$0xff]  ;;  %vm1521_vm2 = vcmask 367616  }
  0x45   :  { %v1918_v6 = vld [vmem:[#allocation9] sm:$0xff]  ;;  %v1922_v8 = vld [vmem:[#allocation9 + $0x10] sm:$0xff]  ;;  %v1924_v9 = vld [vmem:[#allocation7 + $0x28] sm:$0xff]  ;;  %s2032_s4 = sld [smem:[#allocation3 + $0x2]]  ;;  %s2044_s0 = sld [smem:[#allocation3 + $0x6]] }
  0x46   :  { %v223_v18 = vld [vmem:[#allocation6 + $0x158] sm:$0xff]  ;;  %v140_v23 = vld [vmem:[#allocation6 + $0x8] sm:$0xff]  ;;  %vm1953_vm1 = vmpackc.low %vm264_vm0, %vm264_vm0  ;;  %s2060_s6 = sld [smem:[#allocation3 + $0x3]]  ;;  %s2072_s13 = sld [smem:[#allocation3 + $0x7]] }
  0x47   :  { %1559 = vmatprep.mubr.msk.f32.mxu0 %vm264_vm0, %v223_v18  ;;  %1586 = vmatprep.mubr.msk.f32.mxu1 %vm264_vm0, %v140_v23  ;;  %v1966_v33 = vld [vmem:[#allocation7 + $0x38] sm:$0xff]  ;;  %v1968_v34 = vld [vmem:[#allocation9 + $0x28] sm:$0xff]  ;;  %v1978_v40 = vld [vmem:[#allocation7 + $0x20] sm:$0xff] }
  0x48   :  { %v1970_v35 = vld [vmem:[#allocation9 + $0x38] sm:$0xff]  ;;  %v1980_v41 = vld [vmem:[#allocation7 + $0x30] sm:$0xff]  ;;  %v1984_v46 = vld [vmem:[#allocation9 + $0x20] sm:$0xff] }
  0x49   :  { %v1920_v7 = vstv %s1551_s9  ;;  %v1930_v12 = vstv %s1552_s10  ;;  %v1986_v47 = vld [vmem:[#allocation9 + $0x30] sm:$0xff]  ;;  %v2020_v18 = vld [vmem:[#allocation9 + $0x58] sm:$0x1f]  ;;  %v236_v26 = vld [vmem:[#allocation6 + $0x1c0] sm:$0xff] }
  0x4a   :  { %v184_v10 = vmul.f32 %v1920_v7, %v1906_v0  ;;  %v186_v11 = vmul.f32 %v1920_v7, %v1908_v1  ;;  %v183_v13 = vmul.f32 %v1920_v7, %v1912_v3  ;;  %v198_v14 = vmul.f32 %v1930_v12, %v1910_v2 }
  0x4b   :  { %v200_v15 = vmul.f32 %v1930_v12, %v1914_v4  ;;  %v185_v16 = vmul.f32 %v1920_v7, %v1916_v5  ;;  %v197_v17 = vmul.f32 %v1930_v12, %v1918_v6  ;;  %v199_v19 = vmul.f32 %v1930_v12, %v1922_v8 }
  0x4c   :  { %v1944_v20 = vstv %s99_s11  ;;  %v1946_v21 = vstv %s1550_s12  ;;  %v188_v22 = vmul.f32 %v1920_v7, %v1924_v9  ;;  %v210_v24 = vadd.f32 %v198_v14, %v184_v10  ;;  %v2012_v10 = vld [vmem:[#allocation7 + $0x48] sm:$0xff] }
  0x4d   :  { %v212_v25 = vadd.f32 %v200_v15, %v186_v11  ;;  %v209_v27 = vadd.f32 %v197_v17, %v183_v13  ;;  %v102_v28 = vmul.f32 %v1944_v20, %v1906_v0  ;;  %v211_v29 = vadd.f32 %v199_v19, %v185_v16  ;;  %v2016_v16 = vld [vmem:[#allocation7 + $0x58] sm:$0x1f]  ;;  %v2018_v17 = vld [vmem:[#allocation9 + $0x48] sm:$0xff] }
  0x4e   :  { %v104_v30 = vmul.f32 %v1944_v20, %v1908_v1  ;;  %v116_v31 = vmul.f32 %v1946_v21, %v1910_v2  ;;  %v118_v32 = vmul.f32 %v1946_v21, %v1914_v4  ;;  %v101_v37 = vmul.f32 %v1944_v20, %v1912_v3 }
  0x4f   :  { %v1665_v36 = vpack.c.bf16 %v212_v25, %v210_v24  ;;  %v103_v38 = vmul.f32 %v1944_v20, %v1916_v5  ;;  %v115_v39 = vmul.f32 %v1946_v21, %v1918_v6  ;;  %v1668_v42 = vpack.c.bf16 %v211_v29, %v209_v27  ;;  %v2028_v25 = vld [vmem:[#allocation7 + $0x40] sm:$0xff]  ;;  %v2030_v27 = vld [vmem:[#allocation7 + $0x50] sm:$0x1f] }
  0x50   :  { %v128_v43 = vadd.f32 %v116_v31, %v102_v28  ;;  %v130_v44 = vadd.f32 %v118_v32, %v104_v30  ;;  %v117_v45 = vmul.f32 %v1946_v21, %v1922_v8  ;;  %v190_v49 = vmul.f32 %v1920_v7, %v1966_v33  ;;  %v2040_v32 = vld [vmem:[#allocation9 + $0x40] sm:$0xff] }
  0x51   :  { %1667 = vmatprep.subr.msk.bf16.mxu0 %vm1953_vm1, %v1665_v36  ;;  %v127_v48 = vadd.f32 %v115_v39, %v101_v37  ;;  %v202_v50 = vmul.f32 %v1930_v12, %v1968_v34  ;;  %v204_v51 = vmul.f32 %v1930_v12, %v1970_v35  ;;  %v187_v54 = vmul.f32 %v1920_v7, %v1978_v40  ;;  %v2042_v36 = vld [vmem:[#allocation9 + $0x50] sm:$0x1f] }
  0x52   :  { %1669 = vmatpush1.bf16.xpose.msra.mxu0 %v1668_v42  ;;  %v1680_v52 = vpack.c.bf16 %v130_v44, %v128_v43  ;;  %v129_v53 = vadd.f32 %v117_v45, %v103_v38  ;;  %v189_v55 = vmul.f32 %v1920_v7, %v1980_v41  ;;  %v201_v58 = vmul.f32 %v1930_v12, %v1984_v46 }
  0x53   :  { %v214_v56 = vadd.f32 %v202_v50, %v188_v22  ;;  %v216_v57 = vadd.f32 %v204_v51, %v190_v49  ;;  %v203_v59 = vmul.f32 %v1930_v12, %v1986_v47  ;;  %v106_v61 = vmul.f32 %v1944_v20, %v1924_v9 }
  0x54   :  { %1682 = vmatprep.subr.msk.bf16.mxu1 %vm1953_vm1, %v1680_v52  ;;  %v1683_v60 = vpack.c.bf16 %v129_v53, %v127_v48  ;;  %v108_v62 = vmul.f32 %v1944_v20, %v1966_v33  ;;  %v120_v63 = vmul.f32 %v1946_v21, %v1968_v34  ;;  %v213_v13 = vadd.f32 %v201_v58, %v187_v54 }
  0x55   :  { %v1670_v11 = vpack.c.bf16 %v216_v57, %v214_v56  ;;  %v215_v14 = vadd.f32 %v203_v59, %v189_v55  ;;  %v122_v15 = vmul.f32 %v1946_v21, %v1970_v35  ;;  %v105_v22 = vmul.f32 %v1944_v20, %v1978_v40 }
  0x56   :  { %1684 = vmatpush1.bf16.xpose.msra.mxu1 %v1683_v60  ;;  %v132_v19 = vadd.f32 %v120_v63, %v106_v61  ;;  %v107_v23 = vmul.f32 %v1944_v20, %v1980_v41  ;;  %v119_v24 = vmul.f32 %v1946_v21, %v1984_v46  ;;  %v121_v30 = vmul.f32 %v1946_v21, %v1986_v47 }
  0x57   :  { %1672 = vmatprep.subr.msk.bf16.mxu0 %vm1953_vm1, %v1670_v11  ;;  %v1673_v28 = vpack.c.bf16 %v215_v14, %v213_v13  ;;  %v134_v29 = vadd.f32 %v122_v15, %v108_v62  ;;  %v192_v31 = vmul.f32 %v1920_v7, %v2012_v10  ;;  %v194_v38 = vmul.f32 %v1920_v7, %v2016_v16 }
  0x58   :  { %v131_v37 = vadd.f32 %v119_v24, %v105_v22  ;;  %v206_v39 = vmul.f32 %v1930_v12, %v2018_v17  ;;  %v208_v42 = vmul.f32 %v1930_v12, %v2020_v18  ;;  %v133_v44 = vadd.f32 %v121_v30, %v107_v23 }
  0x59   :  { %v1685_v43 = vpack.c.bf16 %v134_v29, %v132_v19  ;;  %v191_v45 = vmul.f32 %v1920_v7, %v2028_v25  ;;  %v193_v48 = vmul.f32 %v1920_v7, %v2030_v27  ;;  %v205_v51 = vmul.f32 %v1930_v12, %v2040_v32 }
  0x5a   :  { %1674 = vmatpush1.bf16.xpose.msra.mxu0 %v1673_v28  ;;  %v218_v49 = vadd.f32 %v206_v39, %v192_v31  ;;  %v220_v50 = vadd.f32 %v208_v42, %v194_v38  ;;  %v207_v52 = vmul.f32 %v1930_v12, %v2042_v36  ;;  %v1688_v53 = vpack.c.bf16 %v133_v44, %v131_v37 }
  0x5b   :  { %1687 = vmatprep.subr.msk.bf16.mxu1 %vm1953_vm1, %v1685_v43  ;;  %v110_v54 = vmul.f32 %v1944_v20, %v2012_v10  ;;  %v112_v7 = vmul.f32 %v1944_v20, %v2016_v16  ;;  %v124_v55 = vmul.f32 %v1946_v21, %v2018_v17  ;;  %v217_v57 = vadd.f32 %v205_v51, %v191_v45 }
  0x5c   :  { %v1675_v56 = vpack.c.bf16 %v220_v50, %v218_v49  ;;  %v219_v58 = vadd.f32 %v207_v52, %v193_v48  ;;  %v126_v12 = vmul.f32 %v1946_v21, %v2020_v18  ;;  %v109_v60 = vmul.f32 %v1944_v20, %v2028_v25 }
  0x5d   :  { %v136_v59 = vadd.f32 %v124_v55, %v110_v54  ;;  %v111_v61 = vmul.f32 %v1944_v20, %v2030_v27  ;;  %v123_v62 = vmul.f32 %v1946_v21, %v2040_v32  ;;  %v125_v13 = vmul.f32 %v1946_v21, %v2042_v36 }
  0x5e   :  { %1689 = vmatpush1.bf16.xpose.msra.mxu1 %v1688_v53  ;;  %1677 = vmatprep.subr.msk.bf16.mxu0 %vm1953_vm1, %v1675_v56  ;;  %v1678_v63 = vpack.c.bf16 %v219_v58, %v217_v57  ;;  %v138_v11 = vadd.f32 %v126_v12, %v112_v7  ;;  %v2085_v14 = vstv %s2032_s4  ;;  %v2092_v22 = vstv %s2044_s0 }
  0x5f   :  { %v135_v15 = vadd.f32 %v123_v62, %v109_v60  ;;  %v770_v19 = vmul.f32 %v2085_v14, %v1906_v0  ;;  %v772_v20 = vmul.f32 %v2085_v14, %v1908_v1  ;;  %v137_v24 = vadd.f32 %v125_v13, %v111_v61  ;;  %v139_v13 = vld [vmem:[#allocation6] sm:$0xff] }
  0x60   :  { %v1690_v23 = vpack.c.bf16 %v138_v11, %v136_v59  ;;  %v784_v28 = vmul.f32 %v2092_v22, %v1910_v2  ;;  %v786_v21 = vmul.f32 %v2092_v22, %v1914_v4  ;;  %v769_v29 = vmul.f32 %v2085_v14, %v1912_v3 }
  0x61   :  { %v771_v30 = vmul.f32 %v2085_v14, %v1916_v5  ;;  %v783_v31 = vmul.f32 %v2092_v22, %v1918_v6  ;;  %v785_v37 = vmul.f32 %v2092_v22, %v1922_v8  ;;  %v1693_v38 = vpack.c.bf16 %v137_v24, %v135_v15  ;;  %v142_v24 = vld [vmem:[#allocation6 + $0x18] sm:$0xff] }
  0x62   :  { %1679 = vmatpush1.bf16.xpose.msra.mxu0 %v1678_v63  ;;  %1692 = vmatprep.subr.msk.bf16.mxu1 %vm1953_vm1, %v1690_v23  ;;  %v796_v39 = vadd.f32 %v784_v28, %v770_v19  ;;  %v798_v42 = vadd.f32 %v786_v21, %v772_v20  ;;  %v2109_v43 = vstv %s2060_s6  ;;  %v2116_v51 = vstv %s2072_s13  ;;  %v224_v19 = vld [vmem:[#allocation6 + $0x160] sm:$0xff] }
  0x63   :  { %v795_v44 = vadd.f32 %v783_v31, %v769_v29  ;;  %v797_v45 = vadd.f32 %v785_v37, %v771_v30  ;;  %v1125_v48 = vmul.f32 %v2109_v43, %v1906_v0  ;;  %v1127_v49 = vmul.f32 %v2109_v43, %v1908_v1  ;;  %v222_v1 = vld [vmem:[#allocation6 + $0x150] sm:$0xff]  ;;  %v227_v31 = vld [vmem:[#allocation6 + $0x178] sm:$0xff] }
  0x64   :  { %v1695_v50 = vpack.c.bf16 %v798_v42, %v796_v39  ;;  %v1124_v52 = vmul.f32 %v2109_v43, %v1912_v3  ;;  %v1126_v53 = vmul.f32 %v2109_v43, %v1916_v5  ;;  %v1139_v7 = vmul.f32 %v2116_v51, %v1910_v2 }
  0x65   :  { %v1698_v54 = vpack.c.bf16 %v797_v45, %v795_v44  ;;  %v1141_v55 = vmul.f32 %v2116_v51, %v1914_v4  ;;  %v1138_v0 = vmul.f32 %v2116_v51, %v1918_v6  ;;  %v1140_v3 = vmul.f32 %v2116_v51, %v1922_v8  ;;  %v225_v4 = vld [vmem:[#allocation6 + $0x168] sm:$0xff]  ;;  %v226_v45 = vld [vmem:[#allocation6 + $0x170] sm:$0xff] }
  0x66   :  { %1694 = vmatpush1.bf16.xpose.msra.mxu1 %v1693_v38  ;;  %1697 = vmatprep.subr.msk.bf16.mxu0 %vm1953_vm1, %v1695_v50  ;;  %v774_v5 = vmul.f32 %v2085_v14, %v1924_v9  ;;  %v776_v2 = vmul.f32 %v2085_v14, %v1966_v33  ;;  %v1151_v56 = vadd.f32 %v1139_v7, %v1125_v48 }
  0x67   :  { %v1153_v57 = vadd.f32 %v1141_v55, %v1127_v49  ;;  %v1150_v58 = vadd.f32 %v1138_v0, %v1124_v52  ;;  %v788_v6 = vmul.f32 %v2092_v22, %v1968_v34  ;;  %v1152_v12 = vadd.f32 %v1140_v3, %v1126_v53  ;;  %v229_v49 = vld [vmem:[#allocation6 + $0x188] sm:$0xff]  ;;  %v143_v3 = vld [vmem:[#allocation6 + $0x20] sm:$0xff] }
  0x68   :  { %v790_v59 = vmul.f32 %v2092_v22, %v1970_v35  ;;  %v773_v8 = vmul.f32 %v2085_v14, %v1978_v40  ;;  %v775_v60 = vmul.f32 %v2085_v14, %v1980_v41  ;;  %v787_v63 = vmul.f32 %v2092_v22, %v1984_v46 }
  0x69   :  { %411 = vmatmul.mubr.f32.vlgmr.msra.gmra.mrb[0].mxu0 %v222_v1  ;;  %v1710_v61 = vpack.c.bf16 %v1153_v57, %v1151_v56  ;;  %v800_v62 = vadd.f32 %v788_v6, %v774_v5  ;;  %v789_v11 = vmul.f32 %v2092_v22, %v1986_v47  ;;  %v1713_v15 = vpack.c.bf16 %v1152_v12, %v1150_v58  ;;  %v228_v5 = vld [vmem:[#allocation6 + $0x180] sm:$0xff]  ;;  %v231_v58 = vld [vmem:[#allocation6 + $0x198] sm:$0xff] }
  0x6a   :  { %1699 = vmatpush1.bf16.xpose.msra.mxu0 %v1698_v54  ;;  %1560 = vmatprep.mubr.msk.f32.mxu0 %vm264_vm0, %v225_v4  ;;  %v802_v20 = vadd.f32 %v790_v59, %v776_v2  ;;  %v1129_v23 = vmul.f32 %v2109_v43, %v1924_v9  ;;  %v799_v28 = vadd.f32 %v787_v63, %v773_v8  ;;  %v146_v4 = vld [vmem:[#allocation6 + $0x38] sm:$0xff] }
  0x6b   :  { %1712 = vmatprep.subr.msk.bf16.mxu1 %vm1953_vm1, %v1710_v61  ;;  %v801_v21 = vadd.f32 %v789_v11, %v775_v60  ;;  %v1131_v29 = vmul.f32 %v2109_v43, %v1966_v33  ;;  %v1143_v30 = vmul.f32 %v2116_v51, %v1968_v34  ;;  %v1145_v38 = vmul.f32 %v2116_v51, %v1970_v35  ;;  %v141_v34 = vld [vmem:[#allocation6 + $0x10] sm:$0xff] }
  0x6c   :  { %v1700_v37 = vpack.c.bf16 %v802_v20, %v800_v62  ;;  %v1128_v9 = vmul.f32 %v2109_v43, %v1978_v40  ;;  %v1130_v39 = vmul.f32 %v2109_v43, %v1980_v41  ;;  %v1142_v33 = vmul.f32 %v2116_v51, %v1984_v46  ;;  %v144_v41 = vld [vmem:[#allocation6 + $0x28] sm:$0xff]  ;;  %v232_v20 = vld [vmem:[#allocation6 + $0x1a0] sm:$0xff] }
  0x6d   :  { %662 = vmatmul.mubr.f32.vlgmr.msra.gmra.mrb[0].mxu1 %v139_v13  ;;  %416 = vmatmul.mubr.f32.gmra.mrb[2].mxu0 %v224_v19  ;;  %v1703_v42 = vpack.c.bf16 %v801_v21, %v799_v28  ;;  %v1155_v44 = vadd.f32 %v1143_v30, %v1129_v23  ;;  %v1157_v48 = vadd.f32 %v1145_v38, %v1131_v29  ;;  %v233_v13 = vld [vmem:[#allocation6 + $0x1a8] sm:$0xff]  ;;  %v147_v19 = vld [vmem:[#allocation6 + $0x40] sm:$0xff]  ;;  %v150_v23 = vld [vmem:[#allocation6 + $0x58] sm:$0xff] }
  0x6e   :  { %1714 = vmatpush1.bf16.xpose.msra.mxu1 %v1713_v15  ;;  %1587 = vmatprep.mubr.msk.f32.mxu1 %vm264_vm0, %v142_v24  ;;  %v1144_v35 = vmul.f32 %v2116_v51, %v1986_v47  ;;  %v778_v40 = vmul.f32 %v2085_v14, %v2012_v10  ;;  %v1154_v46 = vadd.f32 %v1142_v33, %v1128_v9  ;;  %v235_v24 = vld [vmem:[#allocation6 + $0x1b8] sm:$0xff]  ;;  %v152_v21 = vld [vmem:[#allocation6 + $0x68] sm:$0xff]  ;;  %v151_v30 = vld [vmem:[#allocation6 + $0x60] sm:$0xff] }
  0x6f   :  { %1561 = vmatprep.mubr.msk.f32.mxu0 %vm264_vm0, %v227_v31  ;;  %1702 = vmatprep.subr.msk.bf16.mxu0 %vm1953_vm1, %v1700_v37  ;;  %v780_v50 = vmul.f32 %v2085_v14, %v2016_v16  ;;  %v792_v52 = vmul.f32 %v2092_v22, %v2018_v17  ;;  %v1715_v53 = vpack.c.bf16 %v1157_v48, %v1155_v44  ;;  %v237_v29 = vld [vmem:[#allocation6 + $0x1c8] sm:$0xff]  ;;  %v154_v31 = vld [vmem:[#allocation6 + $0x78] sm:$0xff]  ;;  %v153_v38 = vld [vmem:[#allocation6 + $0x70] sm:$0xff] }
  0x70   :  { %v1156_v54 = vadd.f32 %v1144_v35, %v1130_v39  ;;  %v794_v47 = vmul.f32 %v2092_v22, %v2020_v18  ;;  %v777_v7 = vmul.f32 %v2085_v14, %v2028_v25  ;;  %v779_v0 = vmul.f32 %v2085_v14, %v2030_v27  ;;  %v239_v37 = vld [vmem:[#allocation6 + $0x1d8] sm:$0xff]  ;;  %v238_v9 = vld [vmem:[#allocation6 + $0x1d0] sm:$0xff]  ;;  %v156_v39 = vld [vmem:[#allocation6 + $0x88] sm:$0xff] }
  0x71   :  { %667 = vmatmul.mubr.f32.gmra.mrb[2].mxu1 %v141_v34  ;;  %421 = vmatmul.mubr.f32.gmra.mrb[4].mxu0 %v226_v45  ;;  %v804_v55 = vadd.f32 %v792_v52, %v778_v40  ;;  %v791_v1 = vmul.f32 %v2092_v22, %v2040_v32  ;;  %v793_v57 = vmul.f32 %v2092_v22, %v2042_v36  ;;  %v155_v44 = vld [vmem:[#allocation6 + $0x80] sm:$0xff]  ;;  %v158_v34 = vld [vmem:[#allocation6 + $0x98] sm:$0xff]  ;;  %v157_v48 = vld [vmem:[#allocation6 + $0x90] sm:$0xff] }
  0x72   :  { %1588 = vmatprep.mubr.msk.f32.mxu1 %vm264_vm0, %v144_v41  ;;  %1562 = vmatprep.mubr.msk.f32.mxu0 %vm264_vm0, %v229_v49  ;;  %v1718_v2 = vpack.c.bf16 %v1156_v54, %v1154_v46  ;;  %v806_v56 = vadd.f32 %v794_v47, %v780_v50  ;;  %v1133_v6 = vmul.f32 %v2109_v43, %v2012_v10  ;;  %v240_v33 = vld [vmem:[#allocation6 + $0x1e0] sm:$0xff]  ;;  %v243_v45 = vld [vmem:[#allocation6 + $0x1f8] sm:$0xff]  ;;  %v242_v35 = vld [vmem:[#allocation6 + $0x1f0] sm:$0xff] }
  0x73   :  { %1704 = vmatpush1.bf16.xpose.msra.mxu0 %v1703_v42  ;;  %1717 = vmatprep.subr.msk.bf16.mxu1 %vm1953_vm1, %v1715_v53  ;;  %v803_v14 = vadd.f32 %v791_v1, %v777_v7  ;;  %v1135_v12 = vmul.f32 %v2109_v43, %v2016_v16  ;;  %v805_v8 = vadd.f32 %v793_v57, %v779_v0  ;;  %v145_v16 = vld [vmem:[#allocation6 + $0x30] sm:$0xff]  ;;  %v241_v42 = vld [vmem:[#allocation6 + $0x1e8] sm:$0xff]  ;;  %v159_v49 = vld [vmem:[#allocation6 + $0xa0] sm:$0xff] }
  0x74   :  { %v1705_v59 = vpack.c.bf16 %v806_v56, %v804_v55  ;;  %v1147_v60 = vmul.f32 %v2116_v51, %v2018_v17  ;;  %v1149_v22 = vmul.f32 %v2116_v51, %v2020_v18  ;;  %v1132_v61 = vmul.f32 %v2109_v43, %v2028_v25  ;;  %v230_v17 = vld [vmem:[#allocation6 + $0x190] sm:$0xff]  ;;  %v148_v18 = vld [vmem:[#allocation6 + $0x48] sm:$0xff]  ;;  %v244_v46 = vld [vmem:[#allocation6 + $0x200] sm:$0xff] }
  0x75   :  { %672 = vmatmul.mubr.f32.gmra.mrb[4].mxu1 %v143_v3  ;;  %426 = vmatmul.mubr.f32.gmra.mrb[6].mxu0 %v228_v5  ;;  %v1134_v62 = vmul.f32 %v2109_v43, %v2030_v27  ;;  %v1146_v10 = vmul.f32 %v2116_v51, %v2040_v32  ;;  %v1708_v25 = vpack.c.bf16 %v805_v8, %v803_v14  ;;  %v160_v40 = vld [vmem:[#allocation6 + $0xa8] sm:$0xff]  ;;  %v162_v50 = vld [vmem:[#allocation6 + $0xb8] sm:$0xff]  ;;  %v161_v53 = vld [vmem:[#allocation6 + $0xb0] sm:$0xff] }
  0x76   :  { %1589 = vmatprep.mubr.msk.f32.mxu1 %vm264_vm0, %v146_v4  ;;  %1563 = vmatprep.mubr.msk.f32.mxu0 %vm264_vm0, %v231_v58  ;;  %v1159_v63 = vadd.f32 %v1147_v60, %v1133_v6  ;;  %v1161_v11 = vadd.f32 %v1149_v22, %v1135_v12  ;;  %v1148_v27 = vmul.f32 %v2116_v51, %v2042_v36  ;;  %v149_v36 = vld [vmem:[#allocation6 + $0x50] sm:$0xff]  ;;  %v245_v41 = vld [vmem:[#allocation6 + $0x208] sm:$0xff]  ;;  %v247_v52 = vld [vmem:[#allocation6 + $0x218] sm:$0xff] }
  0x77   :  { %1719 = vmatpush1.bf16.xpose.msra.mxu1 %v1718_v2  ;;  %1707 = vmatprep.subr.msk.bf16.mxu0 %vm1953_vm1, %v1705_v59  ;;  %v1158_v43 = vadd.f32 %v1146_v10, %v1132_v61  ;;  %v234_v51 = vld [vmem:[#allocation6 + $0x1b0] sm:$0xff]  ;;  %v164_v47 = vld [vmem:[#allocation6 + $0xc8] sm:$0xff]  ;;  %v163_v55 = vld [vmem:[#allocation6 + $0xc0] sm:$0xff] }
  0x78   :  { %v1720_v32 = vpack.c.bf16 %v1161_v11, %v1159_v63  ;;  %v1160_v15 = vadd.f32 %v1148_v27, %v1134_v62  ;;  %v246_v54 = vld [vmem:[#allocation6 + $0x210] sm:$0xff]  ;;  %v249_v7 = vld [vmem:[#allocation6 + $0x228] sm:$0xff]  ;;  %v248_v0 = vld [vmem:[#allocation6 + $0x220] sm:$0xff] }
  0x79   :  { %677 = vmatmul.mubr.f32.gmra.mrb[6].mxu1 %v145_v16  ;;  %431 = vmatmul.mubr.f32.gmra.mrb[8].mxu0 %v230_v17  ;;  %v166_v1 = vld [vmem:[#allocation6 + $0xd8] sm:$0xff]  ;;  %v165_v5 = vld [vmem:[#allocation6 + $0xd0] sm:$0xff]  ;;  %v168_v56 = vld [vmem:[#allocation6 + $0xe8] sm:$0xff] }
  0x7a   :  { %1590 = vmatprep.mubr.msk.f32.mxu1 %vm264_vm0, %v148_v18  ;;  %1564 = vmatprep.mubr.msk.f32.mxu0 %vm264_vm0, %v233_v13  ;;  %v1723_v28 = vpack.c.bf16 %v1160_v15, %v1158_v43  ;;  %v251_v3 = vld [vmem:[#allocation6 + $0x238] sm:$0xff]  ;;  %v250_v2 = vld [vmem:[#allocation6 + $0x230] sm:$0xff]  ;;  %v253_v57 = vld [vmem:[#allocation6 + $0x248] sm:$0xff] }
  0x7b   :  { %1709 = vmatpush1.bf16.xpose.msra.mxu0 %v1708_v25  ;;  %1722 = vmatprep.subr.msk.bf16.mxu1 %vm1953_vm1, %v1720_v32  ;;  %v167_v4 = vld [vmem:[#allocation6 + $0xe0] sm:$0xff]  ;;  %v170_v14 = vld [vmem:[#allocation6 + $0xf8] sm:$0xff]  ;;  %v169_v12 = vld [vmem:[#allocation6 + $0xf0] sm:$0xff] }
  0x7c   :  { %v252_v58 = vld [vmem:[#allocation6 + $0x240] sm:$0xff]  ;;  %v255_v6 = vld [vmem:[#allocation6 + $0x258] sm:$0xff]  ;;  %v254_v59 = vld [vmem:[#allocation6 + $0x250] sm:$0xff] }
  0x7d   :  { %682 = vmatmul.mubr.f32.gmra.mrb[8].mxu1 %v147_v19  ;;  %436 = vmatmul.mubr.f32.gmra.mrb[10].mxu0 %v232_v20  ;;  %v172_v8 = vld [vmem:[#allocation6 + $0x108] sm:$0xff]  ;;  %v171_v22 = vld [vmem:[#allocation6 + $0x100] sm:$0xff]  ;;  %v174_v62 = vld [vmem:[#allocation6 + $0x118] sm:$0xff] }
  0x7e   :  { %1591 = vmatprep.mubr.msk.f32.mxu1 %vm264_vm0, %v150_v23  ;;  %1565 = vmatprep.mubr.msk.f32.mxu0 %vm264_vm0, %v235_v24  ;;  %v257_v60 = vld [vmem:[#allocation6 + $0x268] sm:$0xff]  ;;  %v256_v61 = vld [vmem:[#allocation6 + $0x260] sm:$0xff]  ;;  %v259_v10 = vld [vmem:[#allocation6 + $0x278] sm:$0xff] }
  0x7f   :  { %1724 = vmatpush1.bf16.xpose.msra.mxu1 %v1723_v28  ;;  %v173_v16 = vld [vmem:[#allocation6 + $0x110] sm:$0xff]  ;;  %v176_v63 = vld [vmem:[#allocation6 + $0x128] sm:$0xff]  ;;  %v175_v18 = vld [vmem:[#allocation6 + $0x120] sm:$0xff] }
  0x80   :  { %v258_v17 = vld [vmem:[#allocation6 + $0x270] sm:$0xff]  ;;  %v261_v11 = vld [vmem:[#allocation6 + $0x288] sm:$0xff]  ;;  %v260_v13 = vld [vmem:[#allocation6 + $0x280] sm:$0xff] }
  0x81   :  { %687 = vmatmul.mubr.f32.gmra.mrb[10].mxu1 %v149_v36  ;;  %441 = vmatmul.mubr.f32.gmra.mrb[12].mxu0 %v234_v51  ;;  %v178_v25 = vld [vmem:[#allocation6 + $0x138] sm:$0xff]  ;;  %v177_v43 = vld [vmem:[#allocation6 + $0x130] sm:$0xff]  ;;  %v180_v15 = vld [vmem:[#allocation6 + $0x148] sm:$0xff] }
  0x82   :  { %1592 = vmatprep.mubr.msk.f32.mxu1 %vm264_vm0, %v152_v21  ;;  %1566 = vmatprep.mubr.msk.f32.mxu0 %vm264_vm0, %v237_v29  ;;  %v263_v27 = vld [vmem:[#allocation6 + $0x298] sm:$0xff]  ;;  %v262_v32 = vld [vmem:[#allocation6 + $0x290] sm:$0xff]  ;;  %v809_v19 = vld [vmem:[#allocation6 + $0x2a8] sm:$0xff] }
  0x83   :  { %v179_v20 = vld [vmem:[#allocation6 + $0x140] sm:$0xff]  ;;  %v1164_v24 = vld [vmem:[#allocation6 + $0x3f8] sm:$0xff]  ;;  %v1163_v36 = vld [vmem:[#allocation6 + $0x3f0] sm:$0xff] }
  0x84   :  { %v808_v23 = vld [vmem:[#allocation6 + $0x2a0] sm:$0xff]  ;;  %v811_v28 = vld [vmem:[#allocation6 + $0x2b8] sm:$0xff]  ;;  %v810_v51 = vld [vmem:[#allocation6 + $0x2b0] sm:$0xff] }
  0x85   :  { %692 = vmatmul.mubr.f32.gmra.mrb[12].mxu1 %v151_v30  ;;  %446 = vmatmul.mubr.f32.gmra.mrb[14].mxu0 %v236_v26  ;;  %v1166_v21 = vld [vmem:[#allocation6 + $0x408] sm:$0xff]  ;;  %v1165_v30 = vld [vmem:[#allocation6 + $0x400] sm:$0xff] }
  0x86   :  { %1593 = vmatprep.mubr.msk.f32.mxu1 %vm264_vm0, %v154_v31  ;;  %1567 = vmatprep.mubr.msk.f32.mxu0 %vm264_vm0, %v239_v37  ;;  %v813_v29 = vld [vmem:[#allocation6 + $0x2c8] sm:$0xff]  ;;  %v812_v26 = vld [vmem:[#allocation6 + $0x2c0] sm:$0xff]  ;;  %v1168_v31 = vld [vmem:[#allocation6 + $0x418] sm:$0xff] }
  0x87   :  { %v815_v37 = vld [vmem:[#allocation6 + $0x2d8] sm:$0xff] }
  0x89   :  { %697 = vmatmul.mubr.f32.gmra.mrb[14].mxu1 %v153_v38  ;;  %451 = vmatmul.mubr.f32.gmra.mrb[16].mxu0 %v238_v9  ;;  %v1167_v38 = vld [vmem:[#allocation6 + $0x410] sm:$0xff] }
  0x8a   :  { %1594 = vmatprep.mubr.msk.f32.mxu1 %vm264_vm0, %v156_v39  ;;  %1568 = vmatprep.mubr.msk.f32.mxu0 %vm264_vm0, %v241_v42  ;;  %v814_v9 = vld [vmem:[#allocation6 + $0x2d0] sm:$0xff]  ;;  %v1170_v39 = vld [vmem:[#allocation6 + $0x428] sm:$0xff] }
  0x8b   :  { %v817_v42 = vld [vmem:[#allocation6 + $0x2e8] sm:$0xff] }
  0x8d   :  { %702 = vmatmul.mubr.f32.gmra.mrb[16].mxu1 %v155_v44  ;;  %456 = vmatmul.mubr.f32.gmra.mrb[18].mxu0 %v240_v33  ;;  %v1169_v44 = vld [vmem:[#allocation6 + $0x420] sm:$0xff] }
  0x8e   :  { %1595 = vmatprep.mubr.msk.f32.mxu1 %vm264_vm0, %v158_v34  ;;  %1569 = vmatprep.mubr.msk.f32.mxu0 %vm264_vm0, %v243_v45  ;;  %v816_v33 = vld [vmem:[#allocation6 + $0x2e0] sm:$0xff]  ;;  %v1172_v34 = vld [vmem:[#allocation6 + $0x438] sm:$0xff] }
  0x8f   :  { %v819_v45 = vld [vmem:[#allocation6 + $0x2f8] sm:$0xff] }
  0x91   :  { %707 = vmatmul.mubr.f32.gmra.mrb[18].mxu1 %v157_v48  ;;  %461 = vmatmul.mubr.f32.gmra.mrb[20].mxu0 %v242_v35  ;;  %v1171_v48 = vld [vmem:[#allocation6 + $0x430] sm:$0xff] }
  0x92   :  { %1596 = vmatprep.mubr.msk.f32.mxu1 %vm264_vm0, %v160_v40  ;;  %1570 = vmatprep.mubr.msk.f32.mxu0 %vm264_vm0, %v245_v41  ;;  %v818_v35 = vld [vmem:[#allocation6 + $0x2f0] sm:$0xff]  ;;  %v1174_v40 = vld [vmem:[#allocation6 + $0x448] sm:$0xff] }
  0x93   :  { %v821_v41 = vld [vmem:[#allocation6 + $0x308] sm:$0xff] }
  0x95   :  { %712 = vmatmul.mubr.f32.gmra.mrb[20].mxu1 %v159_v49  ;;  %466 = vmatmul.mubr.f32.gmra.mrb[22].mxu0 %v244_v46  ;;  %v1173_v49 = vld [vmem:[#allocation6 + $0x440] sm:$0xff] }
  0x96   :  { %1597 = vmatprep.mubr.msk.f32.mxu1 %vm264_vm0, %v162_v50  ;;  %1571 = vmatprep.mubr.msk.f32.mxu0 %vm264_vm0, %v247_v52  ;;  %v820_v46 = vld [vmem:[#allocation6 + $0x300] sm:$0xff]  ;;  %v1176_v50 = vld [vmem:[#allocation6 + $0x458] sm:$0xff] }
  0x97   :  { %v823_v52 = vld [vmem:[#allocation6 + $0x318] sm:$0xff] }
  0x99   :  { %717 = vmatmul.mubr.f32.gmra.mrb[22].mxu1 %v161_v53  ;;  %471 = vmatmul.mubr.f32.gmra.mrb[24].mxu0 %v246_v54  ;;  %v1175_v53 = vld [vmem:[#allocation6 + $0x450] sm:$0xff] }
  0x9a   :  { %1598 = vmatprep.mubr.msk.f32.mxu1 %vm264_vm0, %v164_v47  ;;  %1572 = vmatprep.mubr.msk.f32.mxu0 %vm264_vm0, %v249_v7  ;;  %v822_v54 = vld [vmem:[#allocation6 + $0x310] sm:$0xff]  ;;  %v1178_v47 = vld [vmem:[#allocation6 + $0x468] sm:$0xff] }
  0x9b   :  { %v825_v7 = vld [vmem:[#allocation6 + $0x328] sm:$0xff] }
  0x9d   :  { %722 = vmatmul.mubr.f32.gmra.mrb[24].mxu1 %v163_v55  ;;  %476 = vmatmul.mubr.f32.gmra.mrb[26].mxu0 %v248_v0  ;;  %v1177_v55 = vld [vmem:[#allocation6 + $0x460] sm:$0xff] }
  0x9e   :  { %1599 = vmatprep.mubr.msk.f32.mxu1 %vm264_vm0, %v166_v1  ;;  %1573 = vmatprep.mubr.msk.f32.mxu0 %vm264_vm0, %v251_v3  ;;  %v824_v0 = vld [vmem:[#allocation6 + $0x320] sm:$0xff]  ;;  %v1180_v1 = vld [vmem:[#allocation6 + $0x478] sm:$0xff] }
  0x9f   :  { %v827_v3 = vld [vmem:[#allocation6 + $0x338] sm:$0xff] }
  0xa1   :  { %727 = vmatmul.mubr.f32.gmra.mrb[26].mxu1 %v165_v5  ;;  %481 = vmatmul.mubr.f32.gmra.mrb[28].mxu0 %v250_v2  ;;  %v1179_v5 = vld [vmem:[#allocation6 + $0x470] sm:$0xff] }
  0xa2   :  { %1600 = vmatprep.mubr.msk.f32.mxu1 %vm264_vm0, %v168_v56  ;;  %1574 = vmatprep.mubr.msk.f32.mxu0 %vm264_vm0, %v253_v57  ;;  %v826_v2 = vld [vmem:[#allocation6 + $0x330] sm:$0xff]  ;;  %v1182_v56 = vld [vmem:[#allocation6 + $0x488] sm:$0xff] }
  0xa3   :  { %v829_v57 = vld [vmem:[#allocation6 + $0x348] sm:$0xff] }
  0xa5   :  { %732 = vmatmul.mubr.f32.gmra.mrb[28].mxu1 %v167_v4  ;;  %486 = vmatmul.mubr.f32.gmra.mrb[30].mxu0 %v252_v58  ;;  %v1181_v4 = vld [vmem:[#allocation6 + $0x480] sm:$0xff] }
  0xa6   :  { %1601 = vmatprep.mubr.msk.f32.mxu1 %vm264_vm0, %v170_v14  ;;  %1575 = vmatprep.mubr.msk.f32.mxu0 %vm264_vm0, %v255_v6  ;;  %v828_v58 = vld [vmem:[#allocation6 + $0x340] sm:$0xff]  ;;  %v1184_v14 = vld [vmem:[#allocation6 + $0x498] sm:$0xff] }
  0xa7   :  { %v831_v6 = vld [vmem:[#allocation6 + $0x358] sm:$0xff] }
  0xa9   :  { %737 = vmatmul.mubr.f32.gmra.mrb[30].mxu1 %v169_v12  ;;  %491 = vmatmul.mubr.f32.gmra.mrb[32].mxu0 %v254_v59  ;;  %v1183_v12 = vld [vmem:[#allocation6 + $0x490] sm:$0xff] }
  0xaa   :  { %1602 = vmatprep.mubr.msk.f32.mxu1 %vm264_vm0, %v172_v8  ;;  %1576 = vmatprep.mubr.msk.f32.mxu0 %vm264_vm0, %v257_v60  ;;  %v830_v59 = vld [vmem:[#allocation6 + $0x350] sm:$0xff]  ;;  %v1186_v8 = vld [vmem:[#allocation6 + $0x4a8] sm:$0xff] }
  0xab   :  { %v833_v60 = vld [vmem:[#allocation6 + $0x368] sm:$0xff] }
  0xad   :  { %742 = vmatmul.mubr.f32.gmra.mrb[32].mxu1 %v171_v22  ;;  %496 = vmatmul.mubr.f32.gmra.mrb[34].mxu0 %v256_v61  ;;  %v1185_v22 = vld [vmem:[#allocation6 + $0x4a0] sm:$0xff] }
  0xae   :  { %1603 = vmatprep.mubr.msk.f32.mxu1 %vm264_vm0, %v174_v62  ;;  %1577 = vmatprep.mubr.msk.f32.mxu0 %vm264_vm0, %v259_v10  ;;  %v832_v61 = vld [vmem:[#allocation6 + $0x360] sm:$0xff]  ;;  %v1188_v62 = vld [vmem:[#allocation6 + $0x4b8] sm:$0xff] }
  0xaf   :  { %v835_v10 = vld [vmem:[#allocation6 + $0x378] sm:$0xff] }
  0xb1   :  { %747 = vmatmul.mubr.f32.gmra.mrb[34].mxu1 %v173_v16  ;;  %501 = vmatmul.mubr.f32.gmra.mrb[36].mxu0 %v258_v17  ;;  %v1187_v16 = vld [vmem:[#allocation6 + $0x4b0] sm:$0xff] }
  0xb2   :  { %1604 = vmatprep.mubr.msk.f32.mxu1 %vm264_vm0, %v176_v63  ;;  %1578 = vmatprep.mubr.msk.f32.mxu0 %vm264_vm0, %v261_v11  ;;  %v834_v17 = vld [vmem:[#allocation6 + $0x370] sm:$0xff]  ;;  %v1190_v63 = vld [vmem:[#allocation6 + $0x4c8] sm:$0xff] }
  0xb3   :  { %v837_v11 = vld [vmem:[#allocation6 + $0x388] sm:$0xff] }
  0xb5   :  { %752 = vmatmul.mubr.f32.gmra.mrb[36].mxu1 %v175_v18  ;;  %506 = vmatmul.mubr.f32.gmra.mrb[38].mxu0 %v260_v13  ;;  %v1189_v18 = vld [vmem:[#allocation6 + $0x4c0] sm:$0xff] }
  0xb6   :  { %1605 = vmatprep.mubr.msk.f32.mxu1 %vm264_vm0, %v178_v25  ;;  %1579 = vmatprep.mubr.msk.f32.mxu0 %vm264_vm0, %v263_v27  ;;  %v836_v13 = vld [vmem:[#allocation6 + $0x380] sm:$0xff]  ;;  %v1192_v25 = vld [vmem:[#allocation6 + $0x4d8] sm:$0xff] }
  0xb7   :  { %v839_v27 = vld [vmem:[#allocation6 + $0x398] sm:$0xff] }
  0xb9   :  { %757 = vmatmul.mubr.f32.gmra.mrb[38].mxu1 %v177_v43  ;;  %511 = vmatmul.mubr.f32.gmra.mrb[40].mxu0 %v262_v32  ;;  %v1191_v43 = vld [vmem:[#allocation6 + $0x4d0] sm:$0xff] }
  0xba   :  { %1606 = vmatprep.mubr.msk.f32.mxu1 %vm264_vm0, %v180_v15  ;;  %1615 = vmatprep.mubr.msk.f32.mxu0 %vm264_vm0, %v809_v19  ;;  %v838_v32 = vld [vmem:[#allocation6 + $0x390] sm:$0xff]  ;;  %v1194_v15 = vld [vmem:[#allocation6 + $0x4e8] sm:$0xff] }
  0xbb   :  { %v841_v19 = vld [vmem:[#allocation6 + $0x3a8] sm:$0xff] }
  0xbd   :  { %762 = vmatmul.mubr.f32.gmra.mrb[40].mxu1 %v179_v20  ;;  %996 = vmatmul.mubr.f32.vlgmr.msra.gmra.mrb[42].mxu0 %v808_v23  ;;  %v1193_v20 = vld [vmem:[#allocation6 + $0x4e0] sm:$0xff] }
  0xbe   :  { %1644 = vmatprep.mubr.msk.f32.mxu1 %vm264_vm0, %v1164_v24  ;;  %1616 = vmatprep.mubr.msk.f32.mxu0 %vm264_vm0, %v811_v28  ;;  %v840_v23 = vld [vmem:[#allocation6 + $0x3a0] sm:$0xff]  ;;  %v1196_v24 = vld [vmem:[#allocation6 + $0x4f8] sm:$0xff] }
  0xbf   :  { %v843_v28 = vld [vmem:[#allocation6 + $0x3b8] sm:$0xff] }
  0xc1   :  { %1351 = vmatmul.mubr.f32.vlgmr.msra.gmra.mrb[42].mxu1 %v1163_v36  ;;  %1001 = vmatmul.mubr.f32.gmra.mrb[44].mxu0 %v810_v51  ;;  %v1195_v36 = vld [vmem:[#allocation6 + $0x4f0] sm:$0xff] }
  0xc2   :  { %1645 = vmatprep.mubr.msk.f32.mxu1 %vm264_vm0, %v1166_v21  ;;  %1617 = vmatprep.mubr.msk.f32.mxu0 %vm264_vm0, %v813_v29  ;;  %v842_v51 = vld [vmem:[#allocation6 + $0x3b0] sm:$0xff]  ;;  %v1198_v21 = vld [vmem:[#allocation6 + $0x508] sm:$0xff] }
  0xc3   :  { %v845_v29 = vld [vmem:[#allocation6 + $0x3c8] sm:$0xff] }
  0xc5   :  { %1356 = vmatmul.mubr.f32.gmra.mrb[44].mxu1 %v1165_v30  ;;  %1006 = vmatmul.mubr.f32.gmra.mrb[46].mxu0 %v812_v26  ;;  %v1197_v30 = vld [vmem:[#allocation6 + $0x500] sm:$0xff] }
  0xc6   :  { %1646 = vmatprep.mubr.msk.f32.mxu1 %vm264_vm0, %v1168_v31  ;;  %1618 = vmatprep.mubr.msk.f32.mxu0 %vm264_vm0, %v815_v37  ;;  %v844_v26 = vld [vmem:[#allocation6 + $0x3c0] sm:$0xff]  ;;  %v1200_v31 = vld [vmem:[#allocation6 + $0x518] sm:$0xff] }
  0xc7   :  { %v847_v37 = vld [vmem:[#allocation6 + $0x3d8] sm:$0xff] }
  0xc9   :  { %1361 = vmatmul.mubr.f32.gmra.mrb[46].mxu1 %v1167_v38  ;;  %1011 = vmatmul.mubr.f32.gmra.mrb[48].mxu0 %v814_v9  ;;  %v1199_v38 = vld [vmem:[#allocation6 + $0x510] sm:$0xff] }
  0xca   :  { %1647 = vmatprep.mubr.msk.f32.mxu1 %vm264_vm0, %v1170_v39  ;;  %1619 = vmatprep.mubr.msk.f32.mxu0 %vm264_vm0, %v817_v42  ;;  %v846_v9 = vld [vmem:[#allocation6 + $0x3d0] sm:$0xff]  ;;  %v1202_v39 = vld [vmem:[#allocation6 + $0x528] sm:$0xff] }
  0xcb   :  { %v849_v42 = vld [vmem:[#allocation6 + $0x3e8] sm:$0xff] }
  0xcd   :  { %1366 = vmatmul.mubr.f32.gmra.mrb[48].mxu1 %v1169_v44  ;;  %1016 = vmatmul.mubr.f32.gmra.mrb[50].mxu0 %v816_v33  ;;  %v1201_v44 = vld [vmem:[#allocation6 + $0x520] sm:$0xff] }
  0xce   :  { %1648 = vmatprep.mubr.msk.f32.mxu1 %vm264_vm0, %v1172_v34  ;;  %1620 = vmatprep.mubr.msk.f32.mxu0 %vm264_vm0, %v819_v45  ;;  %v848_v33 = vld [vmem:[#allocation6 + $0x3e0] sm:$0xff]  ;;  %v1204_v34 = vld [vmem:[#allocation6 + $0x538] sm:$0xff]  ;;  %v1203_v45 = vld [vmem:[#allocation6 + $0x530] sm:$0xff] }
  0xd1   :  { %1371 = vmatmul.mubr.f32.gmra.mrb[50].mxu1 %v1171_v48  ;;  %1021 = vmatmul.mubr.f32.gmra.mrb[52].mxu0 %v818_v35 }
  0xd2   :  { %1649 = vmatprep.mubr.msk.f32.mxu1 %vm264_vm0, %v1174_v40  ;;  %1621 = vmatprep.mubr.msk.f32.mxu0 %vm264_vm0, %v821_v41 }
  0xd5   :  { %1376 = vmatmul.mubr.f32.gmra.mrb[52].mxu1 %v1173_v49  ;;  %1026 = vmatmul.mubr.f32.gmra.mrb[54].mxu0 %v820_v46 }
  0xd6   :  { %1650 = vmatprep.mubr.msk.f32.mxu1 %vm264_vm0, %v1176_v50  ;;  %1622 = vmatprep.mubr.msk.f32.mxu0 %vm264_vm0, %v823_v52 }
  0xd9   :  { %1381 = vmatmul.mubr.f32.gmra.mrb[54].mxu1 %v1175_v53  ;;  %1031 = vmatmul.mubr.f32.gmra.mrb[56].mxu0 %v822_v54 }
  0xda   :  { %1651 = vmatprep.mubr.msk.f32.mxu1 %vm264_vm0, %v1178_v47  ;;  %1623 = vmatprep.mubr.msk.f32.mxu0 %vm264_vm0, %v825_v7 }
  0xdd   :  { %1386 = vmatmul.mubr.f32.gmra.mrb[56].mxu1 %v1177_v55  ;;  %1036 = vmatmul.mubr.f32.gmra.mrb[58].mxu0 %v824_v0 }
  0xde   :  { %1652 = vmatprep.mubr.msk.f32.mxu1 %vm264_vm0, %v1180_v1  ;;  %1624 = vmatprep.mubr.msk.f32.mxu0 %vm264_vm0, %v827_v3 }
  0xe1   :  { %1391 = vmatmul.mubr.f32.gmra.mrb[58].mxu1 %v1179_v5  ;;  %1041 = vmatmul.mubr.f32.gmra.mrb[60].mxu0 %v826_v2 }
  0xe2   :  { %1653 = vmatprep.mubr.msk.f32.mxu1 %vm264_vm0, %v1182_v56  ;;  %1625 = vmatprep.mubr.msk.f32.mxu0 %vm264_vm0, %v829_v57 }
  0xe5   :  { %1396 = vmatmul.mubr.f32.gmra.mrb[60].mxu1 %v1181_v4  ;;  %1046 = vmatmul.mubr.f32.gmra.mrb[62].mxu0 %v828_v58 }
  0xe6   :  { %1654 = vmatprep.mubr.msk.f32.mxu1 %vm264_vm0, %v1184_v14  ;;  %1626 = vmatprep.mubr.msk.f32.mxu0 %vm264_vm0, %v831_v6 }
  0xe9   :  { %1401 = vmatmul.mubr.f32.gmra.mrb[62].mxu1 %v1183_v12  ;;  %1051 = vmatmul.mubr.f32.gmra.mrb[64].mxu0 %v830_v59 }
  0xea   :  { %1655 = vmatprep.mubr.msk.f32.mxu1 %vm264_vm0, %v1186_v8  ;;  %1627 = vmatprep.mubr.msk.f32.mxu0 %vm264_vm0, %v833_v60 }
  0xed   :  { %1406 = vmatmul.mubr.f32.gmra.mrb[64].mxu1 %v1185_v22  ;;  %1056 = vmatmul.mubr.f32.gmra.mrb[66].mxu0 %v832_v61 }
  0xee   :  { %1656 = vmatprep.mubr.msk.f32.mxu1 %vm264_vm0, %v1188_v62  ;;  %1628 = vmatprep.mubr.msk.f32.mxu0 %vm264_vm0, %v835_v10 }
  0xf1   :  { %1411 = vmatmul.mubr.f32.gmra.mrb[66].mxu1 %v1187_v16  ;;  %1061 = vmatmul.mubr.f32.gmra.mrb[68].mxu0 %v834_v17 }
  0xf2   :  { %1657 = vmatprep.mubr.msk.f32.mxu1 %vm264_vm0, %v1190_v63  ;;  %1629 = vmatprep.mubr.msk.f32.mxu0 %vm264_vm0, %v837_v11 }
  0xf5   :  { %1416 = vmatmul.mubr.f32.gmra.mrb[68].mxu1 %v1189_v18  ;;  %1066 = vmatmul.mubr.f32.gmra.mrb[70].mxu0 %v836_v13 }
  0xf6   :  { %1658 = vmatprep.mubr.msk.f32.mxu1 %vm264_vm0, %v1192_v25  ;;  %1630 = vmatprep.mubr.msk.f32.mxu0 %vm264_vm0, %v839_v27 }
  0xf9   :  { %1421 = vmatmul.mubr.f32.gmra.mrb[70].mxu1 %v1191_v43  ;;  %1071 = vmatmul.mubr.f32.gmra.mrb[72].mxu0 %v838_v32 }
  0xfa   :  { %1659 = vmatprep.mubr.msk.f32.mxu1 %vm264_vm0, %v1194_v15  ;;  %1631 = vmatprep.mubr.msk.f32.mxu0 %vm264_vm0, %v841_v19 }
  0xfd   :  { %1426 = vmatmul.mubr.f32.gmra.mrb[72].mxu1 %v1193_v20  ;;  %1076 = vmatmul.mubr.f32.gmra.mrb[74].mxu0 %v840_v23 }
  0xfe   :  { %1660 = vmatprep.mubr.msk.f32.mxu1 %vm264_vm0, %v1196_v24  ;;  %1632 = vmatprep.mubr.msk.f32.mxu0 %vm264_vm0, %v843_v28 }
 0x101   :  { %1431 = vmatmul.mubr.f32.gmra.mrb[74].mxu1 %v1195_v36  ;;  %1081 = vmatmul.mubr.f32.gmra.mrb[76].mxu0 %v842_v51 }
 0x102   :  { %1661 = vmatprep.mubr.msk.f32.mxu1 %vm264_vm0, %v1198_v21  ;;  %1633 = vmatprep.mubr.msk.f32.mxu0 %vm264_vm0, %v845_v29 }
 0x105   :  { %1436 = vmatmul.mubr.f32.gmra.mrb[76].mxu1 %v1197_v30  ;;  %1086 = vmatmul.mubr.f32.gmra.mrb[78].mxu0 %v844_v26 }
 0x106   :  { %1662 = vmatprep.mubr.msk.f32.mxu1 %vm264_vm0, %v1200_v31  ;;  %1634 = vmatprep.mubr.msk.f32.mxu0 %vm264_vm0, %v847_v37 }
 0x109   :  { %1441 = vmatmul.mubr.f32.gmra.mrb[78].mxu1 %v1199_v38  ;;  %1091 = vmatmul.mubr.f32.gmra.mrb[80].mxu0 %v846_v9 }
 0x10a   :  { %1663 = vmatprep.mubr.msk.f32.mxu1 %vm264_vm0, %v1202_v39  ;;  %1635 = vmatprep.mubr.msk.f32.mxu0 %vm264_vm0, %v849_v42 }
 0x10d   :  { %1446 = vmatmul.mubr.f32.gmra.mrb[80].mxu1 %v1201_v44  ;;  %1096 = vmatmul.mubr.f32.gmra.mrb[82].mxu0 %v848_v33 }
 0x10e   :  { %1664 = vmatprep.mubr.msk.f32.mxu1 %vm264_vm0, %v1204_v34 }
 0x111   :  { %1451 = vmatmul.mubr.f32.gmra.mrb[82].mxu1 %v1203_v45 }
 0x13c   :  { %v412_v48 = vpop.f32.mrb[0].mxu0 }
 0x13d   :  { %v414_v35 = vpop.f32.mrb[1].mxu0 }
 0x140   :  { %v663_v40 = vpop.f32.mrb[0].mxu1  ;;  %v417_v41 = vpop.f32.mrb[2].mxu0 }
 0x141   :  { %v2288_v49 = vadd.f32 %v663_v40, %v412_v48  ;;  %v665_v46 = vpop.f32.mrb[1].mxu1  ;;  %v419_v50 = vpop.f32.mrb[3].mxu0 }
 0x144   :  { %v668_v52 = vpop.f32.mrb[2].mxu1  ;;  %v422_v53 = vpop.f32.mrb[4].mxu0 }
 0x145   :  { %v2290_v54 = vadd.f32 %v668_v52, %v417_v41  ;;  %v670_v47 = vpop.f32.mrb[3].mxu1  ;;  %v424_v7 = vpop.f32.mrb[5].mxu0 }
 0x148   :  { %v673_v55 = vpop.f32.mrb[4].mxu1  ;;  %v427_v0 = vpop.f32.mrb[6].mxu0 }
 0x149   :  { %v2292_v1 = vadd.f32 %v673_v55, %v422_v53  ;;  %v675_v3 = vpop.f32.mrb[5].mxu1  ;;  %v429_v5 = vpop.f32.mrb[7].mxu0 }
 0x14c   :  { %v678_v2 = vpop.f32.mrb[6].mxu1  ;;  %v432_v56 = vpop.f32.mrb[8].mxu0 }
 0x14d   :  { %v2294_v57 = vadd.f32 %v678_v2, %v427_v0  ;;  %v680_v4 = vpop.f32.mrb[7].mxu1  ;;  %v434_v58 = vpop.f32.mrb[9].mxu0 }
 0x150   :  { %v683_v14 = vpop.f32.mrb[8].mxu1  ;;  %v437_v6 = vpop.f32.mrb[10].mxu0 }
 0x151   :  { %v2296_v12 = vadd.f32 %v683_v14, %v432_v56  ;;  %v685_v59 = vpop.f32.mrb[9].mxu1  ;;  %v439_v8 = vpop.f32.mrb[11].mxu0 }
 0x154   :  { %v688_v60 = vpop.f32.mrb[10].mxu1  ;;  %v442_v22 = vpop.f32.mrb[12].mxu0 }
 0x155   :  { %v2298_v61 = vadd.f32 %v688_v60, %v437_v6  ;;  %v690_v62 = vpop.f32.mrb[11].mxu1  ;;  %v444_v10 = vpop.f32.mrb[13].mxu0 }
 0x158   :  { %v693_v16 = vpop.f32.mrb[12].mxu1  ;;  %v447_v17 = vpop.f32.mrb[14].mxu0 }
 0x159   :  { %v2300_v63 = vadd.f32 %v693_v16, %v442_v22  ;;  %v695_v11 = vpop.f32.mrb[13].mxu1  ;;  %v449_v18 = vpop.f32.mrb[15].mxu0 }
 0x15c   :  { %v698_v13 = vpop.f32.mrb[14].mxu1  ;;  %v452_v25 = vpop.f32.mrb[16].mxu0 }
 0x15d   :  { %v2302_v27 = vadd.f32 %v698_v13, %v447_v17  ;;  %v700_v43 = vpop.f32.mrb[15].mxu1  ;;  %v454_v32 = vpop.f32.mrb[17].mxu0 }
 0x160   :  { %v703_v15 = vpop.f32.mrb[16].mxu1  ;;  %v457_v19 = vpop.f32.mrb[18].mxu0 }
 0x161   :  { %v2304_v20 = vadd.f32 %v703_v15, %v452_v25  ;;  %v705_v23 = vpop.f32.mrb[17].mxu1  ;;  %v459_v24 = vpop.f32.mrb[19].mxu0 }
 0x164   :  { %v708_v28 = vpop.f32.mrb[18].mxu1  ;;  %v462_v36 = vpop.f32.mrb[20].mxu0 }
 0x165   :  { %v2306_v51 = vadd.f32 %v708_v28, %v457_v19  ;;  %v710_v21 = vpop.f32.mrb[19].mxu1  ;;  %v464_v29 = vpop.f32.mrb[21].mxu0 }
 0x168   :  { %v713_v30 = vpop.f32.mrb[20].mxu1  ;;  %v467_v26 = vpop.f32.mrb[22].mxu0 }
 0x169   :  { %v2308_v31 = vadd.f32 %v713_v30, %v462_v36  ;;  %v715_v37 = vpop.f32.mrb[21].mxu1  ;;  %v469_v38 = vpop.f32.mrb[23].mxu0 }
 0x16a   :  { %v2334_v38 = vstv %s2462_s1 }
 0x16c   :  { %v718_v9 = vpop.f32.mrb[22].mxu1  ;;  %v472_v39 = vpop.f32.mrb[24].mxu0 }
 0x16d   :  { %v2310_v42 = vadd.f32 %v718_v9, %v467_v26  ;;  %v720_v44 = vpop.f32.mrb[23].mxu1  ;;  %v474_v33 = vpop.f32.mrb[25].mxu0 }
 0x170   :  { %v723_v34 = vpop.f32.mrb[24].mxu1  ;;  %v477_v45 = vpop.f32.mrb[26].mxu0 }
 0x171   :  { %v2312_v48 = vadd.f32 %v723_v34, %v472_v39  ;;  %v725_v35 = vpop.f32.mrb[25].mxu1  ;;  %v479_v40 = vpop.f32.mrb[27].mxu0 }
 0x174   :  { %v728_v41 = vpop.f32.mrb[26].mxu1  ;;  %v482_v46 = vpop.f32.mrb[28].mxu0 }
 0x175   :  { %v2314_v50 = vadd.f32 %v728_v41, %v477_v45  ;;  %v730_v52 = vpop.f32.mrb[27].mxu1  ;;  %v484_v53 = vpop.f32.mrb[29].mxu0 }
 0x178   :  { %v733_v47 = vpop.f32.mrb[28].mxu1  ;;  %v487_v7 = vpop.f32.mrb[30].mxu0 }
 0x179   :  { %v2316_v55 = vadd.f32 %v733_v47, %v482_v46  ;;  %v735_v0 = vpop.f32.mrb[29].mxu1  ;;  %v489_v3 = vpop.f32.mrb[31].mxu0 }
 0x17c   :  { %v738_v5 = vpop.f32.mrb[30].mxu1  ;;  %v492_v2 = vpop.f32.mrb[32].mxu0 }
 0x17d   :  { %v2318_v56 = vadd.f32 %v738_v5, %v487_v7  ;;  %v740_v4 = vpop.f32.mrb[31].mxu1  ;;  %v494_v58 = vpop.f32.mrb[33].mxu0 }
 0x180   :  { %v743_v14 = vpop.f32.mrb[32].mxu1  ;;  %v497_v6 = vpop.f32.mrb[34].mxu0 }
 0x181   :  { %v2320_v59 = vadd.f32 %v743_v14, %v492_v2  ;;  %v745_v8 = vpop.f32.mrb[33].mxu1  ;;  %v499_v60 = vpop.f32.mrb[35].mxu0 }
 0x184   :  { %v748_v22 = vpop.f32.mrb[34].mxu1  ;;  %v502_v62 = vpop.f32.mrb[36].mxu0 }
 0x185   :  { %v2322_v10 = vadd.f32 %v748_v22, %v497_v6  ;;  %v750_v16 = vpop.f32.mrb[35].mxu1  ;;  %v504_v17 = vpop.f32.mrb[37].mxu0 }
 0x188   :  { %v753_v11 = vpop.f32.mrb[36].mxu1  ;;  %v507_v18 = vpop.f32.mrb[38].mxu0 }
 0x189   :  { %v2324_v13 = vadd.f32 %v753_v11, %v502_v62  ;;  %v755_v25 = vpop.f32.mrb[37].mxu1  ;;  %v509_v43 = vpop.f32.mrb[39].mxu0 }
 0x18c   :  { %v758_v32 = vpop.f32.mrb[38].mxu1  ;;  %v512_v15 = vpop.f32.mrb[40].mxu0 }
 0x18d   :  { %v2326_v19 = vadd.f32 %v758_v32, %v507_v18  ;;  %v760_v23 = vpop.f32.mrb[39].mxu1  ;;  %v514_v24 = vpop.f32.mrb[41].mxu0 }
 0x190   :  { %v763_v28 = vpop.f32.mrb[40].mxu1  ;;  %v997_v36 = vpop.f32.mrb[42].mxu0 }
 0x191   :  { %v2328_v21 = vadd.f32 %v763_v28, %v512_v15  ;;  %v765_v29 = vpop.f32.mrb[41].mxu1  ;;  %v1101_v30 = vadd.f32 %v997_v36, %v2288_v49  ;;  %v999_v26 = vpop.f32.mrb[43].mxu0 }
 0x194   :  { %v1352_v37 = vpop.f32.mrb[42].mxu1  ;;  %v1002_v9 = vpop.f32.mrb[44].mxu0 }
 0x195   :  { %v1456_v39 = vadd.f32 %v1352_v37, %v1101_v30  ;;  %v1354_v44 = vpop.f32.mrb[43].mxu1  ;;  %v1102_v33 = vadd.f32 %v1002_v9, %v2290_v54  ;;  %v1004_v34 = vpop.f32.mrb[45].mxu0 }
 0x197   :  { %v1479_v45 = vadd.f32 %v2334_v38, %v1456_v39 }
 0x198   :  { %v1357_v35 = vpop.f32.mrb[44].mxu1  ;;  %v1007_v40 = vpop.f32.mrb[46].mxu0 }
 0x199   :  { %v1500_v41 = vmax.f32 %v1479_v45, 0.0  ;;  %v1457_v49 = vadd.f32 %v1357_v35, %v1102_v33  ;;  %v1359_v46 = vpop.f32.mrb[45].mxu1  ;;  %v1103_v52 = vadd.f32 %v1007_v40, %v2292_v1  ;;  %v1009_v53 = vpop.f32.mrb[47].mxu0 }
 0x19b   :  { %1522 = vst.msk [vmem:[%s2466_s5] sm:$0xff] %vm1521_vm2, %v1500_v41  ;;  %v1480_v47 = vadd.f32 %v2334_v38, %v1457_v49 }
 0x19c   :  { %v1362_v54 = vpop.f32.mrb[46].mxu1  ;;  %v1012_v7 = vpop.f32.mrb[48].mxu0 }
 0x19d   :  { %v1501_v0 = vmax.f32 %v1480_v47, 0.0  ;;  %v1458_v3 = vadd.f32 %v1362_v54, %v1103_v52  ;;  %v1364_v5 = vpop.f32.mrb[47].mxu1  ;;  %v1104_v2 = vadd.f32 %v1012_v7, %v2294_v57  ;;  %v1014_v4 = vpop.f32.mrb[49].mxu0 }
 0x19f   :  { %1523 = vst.msk [vmem:[%s2466_s5 + $0x8] sm:$0xff] %vm1521_vm2, %v1501_v0  ;;  %v1481_v1 = vadd.f32 %v2334_v38, %v1458_v3 }
 0x1a0   :  { %v1367_v58 = vpop.f32.mrb[48].mxu1  ;;  %v1017_v14 = vpop.f32.mrb[50].mxu0 }
 0x1a1   :  { %v1502_v6 = vmax.f32 %v1481_v1, 0.0  ;;  %v1459_v8 = vadd.f32 %v1367_v58, %v1104_v2  ;;  %v1369_v60 = vpop.f32.mrb[49].mxu1  ;;  %v1105_v22 = vadd.f32 %v1017_v14, %v2296_v12  ;;  %v1019_v62 = vpop.f32.mrb[51].mxu0 }
 0x1a3   :  { %1524 = vst.msk [vmem:[%s2466_s5 + $0x10] sm:$0xff] %vm1521_vm2, %v1502_v6  ;;  %v1482_v57 = vadd.f32 %v2334_v38, %v1459_v8 }
 0x1a4   :  { %v1372_v16 = vpop.f32.mrb[50].mxu1  ;;  %v1022_v17 = vpop.f32.mrb[52].mxu0 }
 0x1a5   :  { %v1503_v11 = vmax.f32 %v1482_v57, 0.0  ;;  %v1460_v18 = vadd.f32 %v1372_v16, %v1105_v22  ;;  %v1374_v25 = vpop.f32.mrb[51].mxu1  ;;  %v1106_v43 = vadd.f32 %v1022_v17, %v2298_v61  ;;  %v1024_v32 = vpop.f32.mrb[53].mxu0 }
 0x1a7   :  { %1525 = vst.msk [vmem:[%s2466_s5 + $0x18] sm:$0xff] %vm1521_vm2, %v1503_v11  ;;  %v1483_v12 = vadd.f32 %v2334_v38, %v1460_v18 }
 0x1a8   :  { %v1377_v15 = vpop.f32.mrb[52].mxu1  ;;  %v1027_v23 = vpop.f32.mrb[54].mxu0 }
 0x1a9   :  { %v1504_v24 = vmax.f32 %v1483_v12, 0.0  ;;  %v1461_v28 = vadd.f32 %v1377_v15, %v1106_v43  ;;  %v1379_v36 = vpop.f32.mrb[53].mxu1  ;;  %v1107_v29 = vadd.f32 %v1027_v23, %v2300_v63  ;;  %v1029_v30 = vpop.f32.mrb[55].mxu0 }
 0x1ab   :  { %1526 = vst.msk [vmem:[%s2466_s5 + $0x20] sm:$0xff] %vm1521_vm2, %v1504_v24  ;;  %v1484_v61 = vadd.f32 %v2334_v38, %v1461_v28 }
 0x1ac   :  { %v1382_v26 = vpop.f32.mrb[54].mxu1  ;;  %v1032_v37 = vpop.f32.mrb[56].mxu0 }
 0x1ad   :  { %v1505_v9 = vmax.f32 %v1484_v61, 0.0  ;;  %v1462_v39 = vadd.f32 %v1382_v26, %v1107_v29  ;;  %v1384_v44 = vpop.f32.mrb[55].mxu1  ;;  %v1108_v33 = vadd.f32 %v1032_v37, %v2302_v27  ;;  %v1034_v34 = vpop.f32.mrb[57].mxu0 }
 0x1af   :  { %1527 = vst.msk [vmem:[%s2466_s5 + $0x28] sm:$0xff] %vm1521_vm2, %v1505_v9  ;;  %v1485_v63 = vadd.f32 %v2334_v38, %v1462_v39 }
 0x1b0   :  { %v1387_v45 = vpop.f32.mrb[56].mxu1  ;;  %v1037_v35 = vpop.f32.mrb[58].mxu0 }
 0x1b1   :  { %v1506_v40 = vmax.f32 %v1485_v63, 0.0  ;;  %v1463_v41 = vadd.f32 %v1387_v45, %v1108_v33  ;;  %v1389_v49 = vpop.f32.mrb[57].mxu1  ;;  %v1109_v46 = vadd.f32 %v1037_v35, %v2304_v20  ;;  %v1039_v52 = vpop.f32.mrb[59].mxu0 }
 0x1b3   :  { %1528 = vst.msk [vmem:[%s2466_s5 + $0x30] sm:$0xff] %vm1521_vm2, %v1506_v40  ;;  %v1486_v27 = vadd.f32 %v2334_v38, %v1463_v41 }
 0x1b4   :  { %v1392_v53 = vpop.f32.mrb[58].mxu1  ;;  %v1042_v47 = vpop.f32.mrb[60].mxu0 }
 0x1b5   :  { %v1507_v54 = vmax.f32 %v1486_v27, 0.0  ;;  %v1464_v7 = vadd.f32 %v1392_v53, %v1109_v46  ;;  %v1394_v0 = vpop.f32.mrb[59].mxu1  ;;  %v1110_v3 = vadd.f32 %v1042_v47, %v2306_v51  ;;  %v1044_v5 = vpop.f32.mrb[61].mxu0 }
 0x1b7   :  { %1529 = vst.msk [vmem:[%s2466_s5 + $0x38] sm:$0xff] %vm1521_vm2, %v1507_v54  ;;  %v1487_v20 = vadd.f32 %v2334_v38, %v1464_v7 }
 0x1b8   :  { %v1397_v2 = vpop.f32.mrb[60].mxu1  ;;  %v1047_v4 = vpop.f32.mrb[62].mxu0 }
 0x1b9   :  { %v1508_v1 = vmax.f32 %v1487_v20, 0.0  ;;  %v1465_v58 = vadd.f32 %v1397_v2, %v1110_v3  ;;  %v1399_v14 = vpop.f32.mrb[61].mxu1  ;;  %v1111_v6 = vadd.f32 %v1047_v4, %v2308_v31  ;;  %v1049_v8 = vpop.f32.mrb[63].mxu0 }
 0x1bb   :  { %1530 = vst.msk [vmem:[%s2466_s5 + $0x40] sm:$0xff] %vm1521_vm2, %v1508_v1  ;;  %v1488_v51 = vadd.f32 %v2334_v38, %v1465_v58 }
 0x1bc   :  { %v1402_v60 = vpop.f32.mrb[62].mxu1  ;;  %v1052_v22 = vpop.f32.mrb[64].mxu0 }
 0x1bd   :  { %v1509_v62 = vmax.f32 %v1488_v51, 0.0  ;;  %v1466_v57 = vadd.f32 %v1402_v60, %v1111_v6  ;;  %v1404_v16 = vpop.f32.mrb[63].mxu1  ;;  %v1112_v17 = vadd.f32 %v1052_v22, %v2310_v42  ;;  %v1054_v11 = vpop.f32.mrb[65].mxu0 }
 0x1bf   :  { %1531 = vst.msk [vmem:[%s2466_s5 + $0x48] sm:$0xff] %vm1521_vm2, %v1509_v62  ;;  %v1489_v31 = vadd.f32 %v2334_v38, %v1466_v57 }
 0x1c0   :  { %v1407_v18 = vpop.f32.mrb[64].mxu1  ;;  %v1057_v25 = vpop.f32.mrb[66].mxu0 }
 0x1c1   :  { %v1510_v43 = vmax.f32 %v1489_v31, 0.0  ;;  %v1467_v32 = vadd.f32 %v1407_v18, %v1112_v17  ;;  %v1409_v12 = vpop.f32.mrb[65].mxu1  ;;  %v1113_v15 = vadd.f32 %v1057_v25, %v2312_v48  ;;  %v1059_v23 = vpop.f32.mrb[67].mxu0 }
 0x1c3   :  { %1532 = vst.msk [vmem:[%s2466_s5 + $0x50] sm:$0xff] %vm1521_vm2, %v1510_v43  ;;  %v1490_v42 = vadd.f32 %v2334_v38, %v1467_v32 }
 0x1c4   :  { %v1412_v24 = vpop.f32.mrb[66].mxu1  ;;  %v1062_v28 = vpop.f32.mrb[68].mxu0 }
 0x1c5   :  { %v1511_v36 = vmax.f32 %v1490_v42, 0.0  ;;  %v1468_v29 = vadd.f32 %v1412_v24, %v1113_v15  ;;  %v1414_v30 = vpop.f32.mrb[67].mxu1  ;;  %v1114_v61 = vadd.f32 %v1062_v28, %v2314_v50  ;;  %v1064_v26 = vpop.f32.mrb[69].mxu0 }
 0x1c7   :  { %1533 = vst.msk [vmem:[%s2466_s5 + $0x58] sm:$0xff] %vm1521_vm2, %v1511_v36  ;;  %v1491_v48 = vadd.f32 %v2334_v38, %v1468_v29 }
 0x1c8   :  { %v1417_v37 = vpop.f32.mrb[68].mxu1  ;;  %v1067_v9 = vpop.f32.mrb[70].mxu0 }
 0x1c9   :  { %v1512_v39 = vmax.f32 %v1491_v48, 0.0  ;;  %v1469_v44 = vadd.f32 %v1417_v37, %v1114_v61  ;;  %v1419_v33 = vpop.f32.mrb[69].mxu1  ;;  %v1115_v34 = vadd.f32 %v1067_v9, %v2316_v55  ;;  %v1069_v63 = vpop.f32.mrb[71].mxu0 }
 0x1cb   :  { %1534 = vst.msk [vmem:[%s2466_s5 + $0x60] sm:$0xff] %vm1521_vm2, %v1512_v39  ;;  %v1492_v50 = vadd.f32 %v2334_v38, %v1469_v44 }
 0x1cc   :  { %v1422_v45 = vpop.f32.mrb[70].mxu1  ;;  %v1072_v35 = vpop.f32.mrb[72].mxu0 }
 0x1cd   :  { %v1513_v40 = vmax.f32 %v1492_v50, 0.0  ;;  %v1470_v41 = vadd.f32 %v1422_v45, %v1115_v34  ;;  %v1424_v49 = vpop.f32.mrb[71].mxu1  ;;  %v1116_v46 = vadd.f32 %v1072_v35, %v2318_v56  ;;  %v1074_v52 = vpop.f32.mrb[73].mxu0 }
 0x1cf   :  { %1535 = vst.msk [vmem:[%s2466_s5 + $0x68] sm:$0xff] %vm1521_vm2, %v1513_v40  ;;  %v1493_v55 = vadd.f32 %v2334_v38, %v1470_v41 }
 0x1d0   :  { %v1427_v27 = vpop.f32.mrb[72].mxu1  ;;  %v1077_v53 = vpop.f32.mrb[74].mxu0 }
 0x1d1   :  { %v1514_v47 = vmax.f32 %v1493_v55, 0.0  ;;  %v1471_v54 = vadd.f32 %v1427_v27, %v1116_v46  ;;  %v1429_v7 = vpop.f32.mrb[73].mxu1  ;;  %v1117_v0 = vadd.f32 %v1077_v53, %v2320_v59  ;;  %v1079_v3 = vpop.f32.mrb[75].mxu0 }
 0x1d3   :  { %1536 = vst.msk [vmem:[%s2466_s5 + $0x70] sm:$0xff] %vm1521_vm2, %v1514_v47  ;;  %v1494_v56 = vadd.f32 %v2334_v38, %v1471_v54 }
 0x1d4   :  { %v1432_v5 = vpop.f32.mrb[74].mxu1  ;;  %v1082_v20 = vpop.f32.mrb[76].mxu0 }
 0x1d5   :  { %v1515_v2 = vmax.f32 %v1494_v56, 0.0  ;;  %v1472_v4 = vadd.f32 %v1432_v5, %v1117_v0  ;;  %v1434_v1 = vpop.f32.mrb[75].mxu1  ;;  %v1118_v58 = vadd.f32 %v1082_v20, %v2322_v10  ;;  %v1084_v14 = vpop.f32.mrb[77].mxu0 }
 0x1d7   :  { %1537 = vst.msk [vmem:[%s2466_s5 + $0x78] sm:$0xff] %vm1521_vm2, %v1515_v2  ;;  %v1495_v59 = vadd.f32 %v2334_v38, %v1472_v4 }
 0x1d8   :  { %v1437_v6 = vpop.f32.mrb[76].mxu1  ;;  %v1087_v8 = vpop.f32.mrb[78].mxu0 }
 0x1d9   :  { %v1516_v51 = vmax.f32 %v1495_v59, 0.0  ;;  %v1473_v60 = vadd.f32 %v1437_v6, %v1118_v58  ;;  %v1439_v22 = vpop.f32.mrb[77].mxu1  ;;  %v1119_v62 = vadd.f32 %v1087_v8, %v2324_v13  ;;  %v1089_v57 = vpop.f32.mrb[79].mxu0 }
 0x1db   :  { %1538 = vst.msk [vmem:[%s2466_s5 + $0x80] sm:$0xff] %vm1521_vm2, %v1516_v51  ;;  %v1496_v10 = vadd.f32 %v2334_v38, %v1473_v60 }
 0x1dc   :  { %v1442_v16 = vpop.f32.mrb[78].mxu1  ;;  %v1092_v17 = vpop.f32.mrb[80].mxu0 }
 0x1dd   :  { %v1517_v11 = vmax.f32 %v1496_v10, 0.0  ;;  %v1474_v31 = vadd.f32 %v1442_v16, %v1119_v62  ;;  %v1444_v18 = vpop.f32.mrb[79].mxu1  ;;  %v1120_v25 = vadd.f32 %v1092_v17, %v2326_v19  ;;  %v1094_v43 = vpop.f32.mrb[81].mxu0 }
 0x1df   :  { %1539 = vst.msk [vmem:[%s2466_s5 + $0x88] sm:$0xff] %vm1521_vm2, %v1517_v11  ;;  %v1497_v13 = vadd.f32 %v2334_v38, %v1474_v31 }
 0x1e0   :  { %v1447_v32 = vpop.f32.mrb[80].mxu1  ;;  %v1097_v12 = vpop.f32.mrb[82].mxu0 }
 0x1e1   :  { %v1518_v15 = vmax.f32 %v1497_v13, 0.0  ;;  %v1475_v23 = vadd.f32 %v1447_v32, %v1120_v25  ;;  %v1449_v42 = vpop.f32.mrb[81].mxu1  ;;  %v1121_v24 = vadd.f32 %v1097_v12, %v2328_v21  ;;  %v1099_v28 = vpop.f32.mrb[83].mxu0 }
 0x1e3   :  { %1540 = vst.msk [vmem:[%s2466_s5 + $0x90] sm:$0xff] %vm1521_vm2, %v1518_v15  ;;  %v1498_v19 = vadd.f32 %v2334_v38, %v1475_v23 }
 0x1e4   :  { %v1452_v36 = vpop.f32.mrb[82].mxu1 }
 0x1e5   :  { %v1519_v29 = vmax.f32 %v1498_v19, 0.0  ;;  %v1476_v30 = vadd.f32 %v1452_v36, %v1121_v24  ;;  %v1454_v61 = vpop.f32.mrb[83].mxu1 }
 0x1e7   :  { %1541 = vst.msk [vmem:[%s2466_s5 + $0x98] sm:$0xff] %vm1521_vm2, %v1519_v29  ;;  %v1499_v26 = vadd.f32 %v2334_v38, %v1476_v30 }
 0x1e9   :  { %v1520_v21 = vmax.f32 %v1499_v26, 0.0 }
 0x1eb   :  { %1542 = vst.msk [vmem:[%s2466_s5 + $0xa0] sm:$0xff] %vm1521_vm2, %v1520_v21 }
 0x1ec   :  { %1547 = vsyncpa [#allocation4], 1 }
 0x1ed   :  { %1548 = vsyncpa [#allocation8], 1 }
 0x1ee   :  { %1549 = vsyncpa [#allocation5], 1 }

</bundles_post_ra>
